<compile_context>
chip_gen: v7x
topology: tpu7x:2x2x1
jax: 0.10.0
libtpu: 0.0.40
codegen_flags: <defaults>
</compile_context>

<pallas_src>
import functools

import jax
import jax.numpy as jnp
from jax import lax
from jax.experimental import pallas as pl
from jax.experimental.pallas import tpu as pltpu


def _round_up(x, m):
    return ((x + m - 1) // m) * m


# ----------------------------------------------------------------------------
# Pallas kernels
# ----------------------------------------------------------------------------
def _conv_tap_kernel(zt_ref, zb_ref, w_ref, o_ref, *, wout, slope):
    """One output row of Conv2d(k=4,s=2,p=1) + LeakyReLU.

    zt_ref/zb_ref: (1, 1, Wq, K) bf16 -- rows i and i+1 of the space-to-depth
                   view (K = 4*Cin_pad, Wq = Wo + 1).
    w_ref:         (4, K, N) bf16     -- per-tap weights (tap = 2*di + dj).
    o_ref:         (1, 1, Wo, N) bf16 -- output row i.
    """
    zt = zt_ref[0, 0]                          # (Wq, K)
    zb = zb_ref[0, 0]
    acc = jnp.dot(zt[0:wout, :], w_ref[0], preferred_element_type=jnp.float32)
    acc += jnp.dot(zt[1:wout + 1, :], w_ref[1], preferred_element_type=jnp.float32)
    acc += jnp.dot(zb[0:wout, :], w_ref[2], preferred_element_type=jnp.float32)
    acc += jnp.dot(zb[1:wout + 1, :], w_ref[3], preferred_element_type=jnp.float32)
    acc = jnp.where(acc >= 0.0, acc, acc * slope)        # fused LeakyReLU (f32)
    o_ref[0, 0] = acc.astype(o_ref.dtype)


def _conv_fc_kernel(zt_ref, zb_ref, w_ref, fcw_ref, fcb_ref, o_ref, *, slope):
    """conv4 (1x1 output) + LeakyReLU + Linear(ndf*8 -> 1) + bias, fused."""
    zt = zt_ref[0, 0]                          # (2, K)
    zb = zb_ref[0, 0]
    acc = jnp.dot(zt[0:1, :], w_ref[0], preferred_element_type=jnp.float32)
    acc += jnp.dot(zt[1:2, :], w_ref[1], preferred_element_type=jnp.float32)
    acc += jnp.dot(zb[0:1, :], w_ref[2], preferred_element_type=jnp.float32)
    acc += jnp.dot(zb[1:2, :], w_ref[3], preferred_element_type=jnp.float32)
    feat = jnp.where(acc >= 0.0, acc, acc * slope)       # (1, N) f32 feature
    out = jnp.dot(feat, fcw_ref[...], preferred_element_type=jnp.float32)
    o_ref[0] = (out + fcb_ref[...]).astype(o_ref.dtype)  # (1, N); lane 0 is real


# ----------------------------------------------------------------------------
# Layout plumbing (wrapper side; same-size data, no 16x amplification)
# ----------------------------------------------------------------------------
def _pad_channels(x, c_to):
    c = x.shape[-1]
    if c == c_to:
        return x
    return jnp.pad(x, ((0, 0), (0, 0), (0, 0), (0, c_to - c)))


def _space_to_depth(x):
    """(B, Hp, Wp, C) -> (B, Hp/2, Wp/2, 4C), channel = (2*rh + rw)*C + c."""
    B, Hp, Wp, C = x.shape
    z = x.reshape(B, Hp // 2, 2, Wp // 2, 2, C)
    z = jnp.transpose(z, (0, 1, 3, 2, 4, 5))
    return z.reshape(B, Hp // 2, Wp // 2, 4 * C)


def _conv_weight_to_s2d(w_oihw, cin_pad, cout_pad):
    """PyTorch OIHW (Cout,Cin,4,4) -> (4 taps, 4*Cin_pad, Cout_pad).

    tap = 2*di + dj, row = (2*rh + rw)*Cin_pad + c, where kh=2*di+rh, kw=2*dj+rw.
    """
    O, C, KH, KW = w_oihw.shape
    assert KH == 4 and KW == 4
    w = jnp.pad(w_oihw, ((0, cout_pad - O), (0, cin_pad - C), (0, 0), (0, 0)))
    w6 = w.reshape(cout_pad, cin_pad, 2, 2, 2, 2)   # (o, c, di, rh, dj, rw)
    t = jnp.transpose(w6, (2, 4, 3, 5, 1, 0))       # (di, dj, rh, rw, c, o)
    return t.reshape(4, 4 * cin_pad, cout_pad)


# ----------------------------------------------------------------------------
# Per-layer wrappers
# ----------------------------------------------------------------------------
def conv_down_lrelu(x_nhwc, w_tap, slope):
    """Conv2d(k=4,s=2,p=1,bias=False) + LeakyReLU, NHWC, padded channels, bf16."""
    B, H, W, C = x_nhwc.shape
    assert H % 2 == 0 and W % 2 == 0
    Ho, Wo = H // 2, W // 2
    z = _space_to_depth(jnp.pad(x_nhwc, ((0, 0), (1, 1), (1, 1), (0, 0))))
    _, Hq, Wq, K = z.shape                 # Hq = Ho + 1, Wq = Wo + 1, K = 4*C
    N = w_tap.shape[-1]
    kernel = functools.partial(_conv_tap_kernel, wout=Wo, slope=slope)
    flops = 2 * B * Ho * Wo * 4 * K * N
    bytes_acc = 2 * z.size * z.dtype.itemsize + w_tap.size * 2 + B * Ho * Wo * N * 2
    return pl.pallas_call(
        kernel,
        out_shape=jax.ShapeDtypeStruct((B, Ho, Wo, N), jnp.bfloat16),
        grid=(B, Ho),
        in_specs=[
            pl.BlockSpec((1, 1, Wq, K), lambda b, i: (b, i, 0, 0)),      # z row i
            pl.BlockSpec((1, 1, Wq, K), lambda b, i: (b, i + 1, 0, 0)),  # z row i+1
            pl.BlockSpec((4, K, N), lambda b, i: (0, 0, 0)),             # tap weights (resident)
        ],
        out_specs=pl.BlockSpec((1, 1, Wo, N), lambda b, i: (b, i, 0, 0)),
        compiler_params=pltpu.CompilerParams(
            dimension_semantics=("parallel", "parallel")),
        cost_estimate=pl.CostEstimate(
            flops=flops, transcendentals=0, bytes_accessed=bytes_acc),
    )(z, z, w_tap)


def conv_fc_fused(x_nhwc, w_tap, fc_w_pad, fc_b_pad, slope):
    """Final conv (1x1 spatial output) + LeakyReLU + Linear + bias in one kernel."""
    B, H, W, C = x_nhwc.shape
    assert H == 2 and W == 2, "fused conv4+FC requires a 1x1 final spatial size"
    z = _space_to_depth(jnp.pad(x_nhwc, ((0, 0), (1, 1), (1, 1), (0, 0))))
    _, Hq, Wq, K = z.shape                 # (B, 2, 2, 4*C)
    N = w_tap.shape[-1]
    kernel = functools.partial(_conv_fc_kernel, slope=slope)
    out = pl.pallas_call(
        kernel,
        out_shape=jax.ShapeDtypeStruct((B, 1, N), jnp.float32),
        grid=(B,),
        in_specs=[
            pl.BlockSpec((1, 1, Wq, K), lambda b: (b, 0, 0, 0)),
            pl.BlockSpec((1, 1, Wq, K), lambda b: (b, 1, 0, 0)),
            pl.BlockSpec((4, K, N), lambda b: (0, 0, 0)),
            pl.BlockSpec((N, N), lambda b: (0, 0)),
            pl.BlockSpec((1, N), lambda b: (0, 0)),
        ],
        out_specs=pl.BlockSpec((1, 1, N), lambda b: (b, 0, 0)),
        compiler_params=pltpu.CompilerParams(dimension_semantics=("parallel",)),
    )(z, z, w_tap, fc_w_pad, fc_b_pad)
    return out[:, 0, 0]


# ----------------------------------------------------------------------------
# DiscriminatorLinear forward
# ----------------------------------------------------------------------------
def init_params(key, in_chn, ndf):
    """normal(0, 0.02) weights, zero bias — matches module._initialize()."""
    ks = jax.random.split(key, 5)
    std = 0.02
    return {
        "conv1": jax.random.normal(ks[0], (ndf, in_chn, 4, 4), jnp.float32) * std,
        "conv2": jax.random.normal(ks[1], (ndf * 2, ndf, 4, 4), jnp.float32) * std,
        "conv3": jax.random.normal(ks[2], (ndf * 4, ndf * 2, 4, 4), jnp.float32) * std,
        "conv4": jax.random.normal(ks[3], (ndf * 8, ndf * 4, 4, 4), jnp.float32) * std,
        "fc_w": jax.random.normal(ks[4], (1, ndf * 8), jnp.float32) * std,
        "fc_b": jnp.zeros((1,), jnp.float32),
    }


def discriminator_linear_forward(params, x_nchw, ndf, slope=0.2):
    B, C_in, H, W = x_nchw.shape
    # feature.view(-1, ndf*8) in the PyTorch module only matches this flatten
    # when the final spatial size is 1x1, i.e. a 16x16 input for 4 /2 convs.
    assert H == 16 and W == 16, "DiscriminatorLinear kernel expects 16x16 inputs"
    # TODO(synk): other resolutions would need PyTorch's NCHW flatten order.

    cin0 = _round_up(C_in, 32)                       # 4*cin0 is a multiple of 128
    couts = [ndf, ndf * 2, ndf * 4, ndf * 8]
    cpads = [_round_up(c, 128) for c in couts]       # lane-dense, carried forward
    cins = [cin0] + cpads[:3]

    # One-time weight repack (in real use this is precomputed, not per-step).
    names = ["conv1", "conv2", "conv3", "conv4"]
    w_taps = [
        _conv_weight_to_s2d(params[n], ci, co).astype(jnp.bfloat16)
        for n, ci, co in zip(names, cins, cpads)
    ]
    nf = cpads[3]
    fc_w_pad = jnp.zeros((nf, nf), jnp.float32).at[: ndf * 8, 0].set(params["fc_w"][0])
    fc_b_pad = jnp.zeros((1, nf), jnp.float32).at[0, 0].set(params["fc_b"][0])

    # NCHW -> NHWC once; channel-pad; bf16 activations end-to-end.
    x = jnp.transpose(x_nchw, (0, 2, 3, 1))
    x = _pad_channels(x, cin0).astype(jnp.bfloat16)

    h = conv_down_lrelu(x, w_taps[0], slope)         # (B, 8, 8, 128)
    h = conv_down_lrelu(h, w_taps[1], slope)         # (B, 4, 4, 128)
    h = conv_down_lrelu(h, w_taps[2], slope)         # (B, 2, 2, 128)
    return conv_fc_fused(h, w_taps[3], fc_w_pad, fc_b_pad, slope)   # (B,)


# ----------------------------------------------------------------------------
# Pure-JAX reference (lax.conv), numerics-matched (bf16 in / f32 accumulate).
# ----------------------------------------------------------------------------
def _lrelu(x, slope):
    return jnp.where(x >= 0.0, x, slope * x)


def reference_forward(params, x_nchw, ndf, slope=0.2):
    def conv(x, w):
        return lax.conv_general_dilated(
            x.astype(jnp.bfloat16), w.astype(jnp.bfloat16),
            window_strides=(2, 2), padding=[(1, 1), (1, 1)],
            dimension_numbers=("NCHW", "OIHW", "NCHW"),
            preferred_element_type=jnp.float32)

    h = _lrelu(conv(x_nchw, params["conv1"]), slope).astype(jnp.bfloat16)
    h = _lrelu(conv(h, params["conv2"]), slope).astype(jnp.bfloat16)
    h = _lrelu(conv(h, params["conv3"]), slope).astype(jnp.bfloat16)
    h = _lrelu(conv(h, params["conv4"]), slope)            # f32, matches fused kernel
    feat = h.reshape(-1, ndf * 8)
    out = feat @ params["fc_w"].T + params["fc_b"]
    return out.reshape(-1)


if __name__ == "__main__":
    B, C_IN, HW = 2, 4, 16      # 16 -> 8 -> 4 -> 2 -> 1 spatial
    NDF = 8
    SLOPE = 0.2

    key = jax.random.PRNGKey(0)
    k_param, k_x = jax.random.split(key)
    params = init_params(k_param, C_IN, NDF)
    x = jax.random.normal(k_x, (B, C_IN, HW, HW), jnp.float32)

    fwd = jax.jit(functools.partial(discriminator_linear_forward, ndf=NDF, slope=SLOPE))
    out = jax.block_until_ready(fwd(params, x))

    ref = jax.block_until_ready(reference_forward(params, x, NDF, SLOPE))
    assert out.shape == (B,), out.shape
    assert jnp.allclose(out, ref, atol=1e-5, rtol=2e-2), (out, ref)

    print("KERNEL_OK")
</pallas_src>

<mosaic_0001>
module attributes {stable_mosaic.version = 11 : i64} {
  func.func @_conv_tap_kernel(%arg0: i32, %arg1: i32, %arg2: memref<1x1x9x128xbf16, #tpu.memory_space<vmem>>, %arg3: memref<1x1x9x128xbf16, #tpu.memory_space<vmem>>, %arg4: memref<4x128x128xbf16, #tpu.memory_space<vmem>>, %arg5: memref<1x1x8x128xbf16, #tpu.memory_space<vmem>>) attributes {dimension_semantics = [#tpu.dimension_semantics<parallel>, #tpu.dimension_semantics<parallel>], iteration_bounds = array<i64: 2, 8>, scalar_prefetch = 0 : i64, scratch_operands = 0 : i64, tpu.core_type = #tpu.core_type<tc>, window_params = [{transform_indices = @transform_0, window_bounds = array<i64: 1, 1, 9, 128>}, {transform_indices = @transform_1, window_bounds = array<i64: 1, 1, 9, 128>}, {pipeline_mode = #tpu.pipeline_mode<synchronous>, transform_indices = @transform_2, window_bounds = array<i64: 4, 128, 128>}, {transform_indices = @transform_3, window_bounds = array<i64: 1, 1, 8, 128>}]} {
    %c0 = arith.constant 0 : index
    %c0_0 = arith.constant 0 : index
    %c0_1 = arith.constant 0 : index
    %c0_2 = arith.constant 0 : index
    %0 = vector.load %arg2[%c0, %c0_0, %c0_1, %c0_2] : memref<1x1x9x128xbf16, #tpu.memory_space<vmem>>, vector<1x1x9x128xbf16>
    %1 = vector.shape_cast %0 : vector<1x1x9x128xbf16> to vector<9x128xbf16>
    %c0_3 = arith.constant 0 : index
    %c0_4 = arith.constant 0 : index
    %c0_5 = arith.constant 0 : index
    %c0_6 = arith.constant 0 : index
    %2 = vector.load %arg3[%c0_3, %c0_4, %c0_5, %c0_6] : memref<1x1x9x128xbf16, #tpu.memory_space<vmem>>, vector<1x1x9x128xbf16>
    %3 = vector.shape_cast %2 : vector<1x1x9x128xbf16> to vector<9x128xbf16>
    %4 = vector.extract_strided_slice %1 {offsets = [0, 0], sizes = [8, 128], strides = [1, 1]} : vector<9x128xbf16> to vector<8x128xbf16>
    %c0_7 = arith.constant 0 : index
    %c0_8 = arith.constant 0 : index
    %c0_9 = arith.constant 0 : index
    %5 = vector.load %arg4[%c0_7, %c0_8, %c0_9] : memref<4x128x128xbf16, #tpu.memory_space<vmem>>, vector<1x128x128xbf16>
    %6 = vector.shape_cast %5 : vector<1x128x128xbf16> to vector<128x128xbf16>
    %cst = arith.constant dense<0.000000e+00> : vector<8x128xf32>
    %7 = tpu.matmul %4, %6, %cst {dimension_numbers = #tpu.dot_dimension_numbers<[1], [0], [0], [1], [0, 0, 1, 1], [], []>} : vector<8x128xbf16>, vector<128x128xbf16>, vector<8x128xf32> -> vector<8x128xf32>
    %8 = vector.extract_strided_slice %1 {offsets = [1, 0], sizes = [8, 128], strides = [1, 1]} : vector<9x128xbf16> to vector<8x128xbf16>
    %c1 = arith.constant 1 : index
    %c0_10 = arith.constant 0 : index
    %c0_11 = arith.constant 0 : index
    %9 = vector.load %arg4[%c1, %c0_10, %c0_11] : memref<4x128x128xbf16, #tpu.memory_space<vmem>>, vector<1x128x128xbf16>
    %10 = vector.shape_cast %9 : vector<1x128x128xbf16> to vector<128x128xbf16>
    %cst_12 = arith.constant dense<0.000000e+00> : vector<8x128xf32>
    %11 = tpu.matmul %8, %10, %cst_12 {dimension_numbers = #tpu.dot_dimension_numbers<[1], [0], [0], [1], [0, 0, 1, 1], [], []>} : vector<8x128xbf16>, vector<128x128xbf16>, vector<8x128xf32> -> vector<8x128xf32>
    %12 = arith.addf %7, %11 : vector<8x128xf32>
    %13 = vector.extract_strided_slice %3 {offsets = [0, 0], sizes = [8, 128], strides = [1, 1]} : vector<9x128xbf16> to vector<8x128xbf16>
    %c2 = arith.constant 2 : index
    %c0_13 = arith.constant 0 : index
    %c0_14 = arith.constant 0 : index
    %14 = vector.load %arg4[%c2, %c0_13, %c0_14] : memref<4x128x128xbf16, #tpu.memory_space<vmem>>, vector<1x128x128xbf16>
    %15 = vector.shape_cast %14 : vector<1x128x128xbf16> to vector<128x128xbf16>
    %cst_15 = arith.constant dense<0.000000e+00> : vector<8x128xf32>
    %16 = tpu.matmul %13, %15, %cst_15 {dimension_numbers = #tpu.dot_dimension_numbers<[1], [0], [0], [1], [0, 0, 1, 1], [], []>} : vector<8x128xbf16>, vector<128x128xbf16>, vector<8x128xf32> -> vector<8x128xf32>
    %17 = arith.addf %12, %16 : vector<8x128xf32>
    %18 = vector.extract_strided_slice %3 {offsets = [1, 0], sizes = [8, 128], strides = [1, 1]} : vector<9x128xbf16> to vector<8x128xbf16>
    %c3 = arith.constant 3 : index
    %c0_16 = arith.constant 0 : index
    %c0_17 = arith.constant 0 : index
    %19 = vector.load %arg4[%c3, %c0_16, %c0_17] : memref<4x128x128xbf16, #tpu.memory_space<vmem>>, vector<1x128x128xbf16>
    %20 = vector.shape_cast %19 : vector<1x128x128xbf16> to vector<128x128xbf16>
    %cst_18 = arith.constant dense<0.000000e+00> : vector<8x128xf32>
    %21 = tpu.matmul %18, %20, %cst_18 {dimension_numbers = #tpu.dot_dimension_numbers<[1], [0], [0], [1], [0, 0, 1, 1], [], []>} : vector<8x128xbf16>, vector<128x128xbf16>, vector<8x128xf32> -> vector<8x128xf32>
    %22 = arith.addf %17, %21 : vector<8x128xf32>
    %cst_19 = arith.constant 0.000000e+00 : f32
    %23 = vector.broadcast %cst_19 : f32 to vector<8x128xf32>
    %24 = arith.cmpf oge, %22, %23 : vector<8x128xf32>
    %cst_20 = arith.constant 2.000000e-01 : f32
    %25 = vector.broadcast %cst_20 : f32 to vector<8x128xf32>
    %26 = arith.mulf %22, %25 : vector<8x128xf32>
    %27 = arith.select %24, %22, %26 : vector<8x128xi1>, vector<8x128xf32>
    %28 = arith.truncf %27 : vector<8x128xf32> to vector<8x128xbf16>
    %c0_21 = arith.constant 0 : index
    %c0_22 = arith.constant 0 : index
    %c0_23 = arith.constant 0 : index
    %c0_24 = arith.constant 0 : index
    %29 = vector.load %arg5[%c0_21, %c0_22, %c0_23, %c0_24] : memref<1x1x8x128xbf16, #tpu.memory_space<vmem>>, vector<1x1x8x128xbf16>
    %30 = vector.shape_cast %29 : vector<1x1x8x128xbf16> to vector<8x128xbf16>
    %31 = vector.shape_cast %28 : vector<8x128xbf16> to vector<1x1x8x128xbf16>
    tpu.vector_store %arg5[%c0_21, %c0_22, %c0_23, %c0_24], %31 {strides = array<i32>} : memref<1x1x8x128xbf16, #tpu.memory_space<vmem>>, vector<1x1x8x128xbf16>,
    return
  }
  func.func @transform_0(%arg0: i32, %arg1: i32) -> (i32, i32, i32, i32) {
    %c0_i32 = arith.constant 0 : i32
    %c0_i32_0 = arith.constant 0 : i32
    %c0_i32_1 = arith.constant 0 : i32
    return %arg0, %arg1, %c0_i32, %c0_i32_0 : i32, i32, i32, i32
  }
  func.func @transform_1(%arg0: i32, %arg1: i32) -> (i32, i32, i32, i32) {
    %c1_i32 = arith.constant 1 : i32
    %0 = arith.addi %arg1, %c1_i32 : i32
    %c0_i32 = arith.constant 0 : i32
    %c0_i32_0 = arith.constant 0 : i32
    %c0_i32_1 = arith.constant 0 : i32
    return %arg0, %0, %c0_i32, %c0_i32_0 : i32, i32, i32, i32
  }
  func.func @transform_2(%arg0: i32, %arg1: i32) -> (i32, i32, i32) {
    %c0_i32 = arith.constant 0 : i32
    %c0_i32_0 = arith.constant 0 : i32
    %c0_i32_1 = arith.constant 0 : i32
    %c0_i32_2 = arith.constant 0 : i32
    return %c0_i32, %c0_i32_0, %c0_i32_1 : i32, i32, i32
  }
  func.func @transform_3(%arg0: i32, %arg1: i32) -> (i32, i32, i32, i32) {
    %c0_i32 = arith.constant 0 : i32
    %c0_i32_0 = arith.constant 0 : i32
    %c0_i32_1 = arith.constant 0 : i32
    return %arg0, %arg1, %c0_i32, %c0_i32_0 : i32, i32, i32, i32
  }
}

module attributes {stable_mosaic.version = 11 : i64} {
  func.func @_conv_tap_kernel(%arg0: i32, %arg1: i32, %arg2: memref<1x1x5x512xbf16, #tpu.memory_space<vmem>>, %arg3: memref<1x1x5x512xbf16, #tpu.memory_space<vmem>>, %arg4: memref<4x512x128xbf16, #tpu.memory_space<vmem>>, %arg5: memref<1x1x4x128xbf16, #tpu.memory_space<vmem>>) attributes {dimension_semantics = [#tpu.dimension_semantics<parallel>, #tpu.dimension_semantics<parallel>], iteration_bounds = array<i64: 2, 4>, scalar_prefetch = 0 : i64, scratch_operands = 0 : i64, tpu.core_type = #tpu.core_type<tc>, window_params = [{transform_indices = @transform_0, window_bounds = array<i64: 1, 1, 5, 512>}, {transform_indices = @transform_1, window_bounds = array<i64: 1, 1, 5, 512>}, {pipeline_mode = #tpu.pipeline_mode<synchronous>, transform_indices = @transform_2, window_bounds = array<i64: 4, 512, 128>}, {transform_indices = @transform_3, window_bounds = array<i64: 1, 1, 4, 128>}]} {
    %c0 = arith.constant 0 : index
    %c0_0 = arith.constant 0 : index
    %c0_1 = arith.constant 0 : index
    %c0_2 = arith.constant 0 : index
    %0 = vector.load %arg2[%c0, %c0_0, %c0_1, %c0_2] : memref<1x1x5x512xbf16, #tpu.memory_space<vmem>>, vector<1x1x5x512xbf16>
    %1 = vector.shape_cast %0 : vector<1x1x5x512xbf16> to vector<5x512xbf16>
    %c0_3 = arith.constant 0 : index
    %c0_4 = arith.constant 0 : index
    %c0_5 = arith.constant 0 : index
    %c0_6 = arith.constant 0 : index
    %2 = vector.load %arg3[%c0_3, %c0_4, %c0_5, %c0_6] : memref<1x1x5x512xbf16, #tpu.memory_space<vmem>>, vector<1x1x5x512xbf16>
    %3 = vector.shape_cast %2 : vector<1x1x5x512xbf16> to vector<5x512xbf16>
    %4 = vector.extract_strided_slice %1 {offsets = [0, 0], sizes = [4, 512], strides = [1, 1]} : vector<5x512xbf16> to vector<4x512xbf16>
    %c0_7 = arith.constant 0 : index
    %c0_8 = arith.constant 0 : index
    %c0_9 = arith.constant 0 : index
    %5 = vector.load %arg4[%c0_7, %c0_8, %c0_9] : memref<4x512x128xbf16, #tpu.memory_space<vmem>>, vector<1x512x128xbf16>
    %6 = vector.shape_cast %5 : vector<1x512x128xbf16> to vector<512x128xbf16>
    %cst = arith.constant dense<0.000000e+00> : vector<4x128xf32>
    %7 = tpu.matmul %4, %6, %cst {dimension_numbers = #tpu.dot_dimension_numbers<[1], [0], [0], [1], [0, 0, 1, 1], [], []>} : vector<4x512xbf16>, vector<512x128xbf16>, vector<4x128xf32> -> vector<4x128xf32>
    %8 = vector.extract_strided_slice %1 {offsets = [1, 0], sizes = [4, 512], strides = [1, 1]} : vector<5x512xbf16> to vector<4x512xbf16>
    %c1 = arith.constant 1 : index
    %c0_10 = arith.constant 0 : index
    %c0_11 = arith.constant 0 : index
    %9 = vector.load %arg4[%c1, %c0_10, %c0_11] : memref<4x512x128xbf16, #tpu.memory_space<vmem>>, vector<1x512x128xbf16>
    %10 = vector.shape_cast %9 : vector<1x512x128xbf16> to vector<512x128xbf16>
    %cst_12 = arith.constant dense<0.000000e+00> : vector<4x128xf32>
    %11 = tpu.matmul %8, %10, %cst_12 {dimension_numbers = #tpu.dot_dimension_numbers<[1], [0], [0], [1], [0, 0, 1, 1], [], []>} : vector<4x512xbf16>, vector<512x128xbf16>, vector<4x128xf32> -> vector<4x128xf32>
    %12 = arith.addf %7, %11 : vector<4x128xf32>
    %13 = vector.extract_strided_slice %3 {offsets = [0, 0], sizes = [4, 512], strides = [1, 1]} : vector<5x512xbf16> to vector<4x512xbf16>
    %c2 = arith.constant 2 : index
    %c0_13 = arith.constant 0 : index
    %c0_14 = arith.constant 0 : index
    %14 = vector.load %arg4[%c2, %c0_13, %c0_14] : memref<4x512x128xbf16, #tpu.memory_space<vmem>>, vector<1x512x128xbf16>
    %15 = vector.shape_cast %14 : vector<1x512x128xbf16> to vector<512x128xbf16>
    %cst_15 = arith.constant dense<0.000000e+00> : vector<4x128xf32>
    %16 = tpu.matmul %13, %15, %cst_15 {dimension_numbers = #tpu.dot_dimension_numbers<[1], [0], [0], [1], [0, 0, 1, 1], [], []>} : vector<4x512xbf16>, vector<512x128xbf16>, vector<4x128xf32> -> vector<4x128xf32>
    %17 = arith.addf %12, %16 : vector<4x128xf32>
    %18 = vector.extract_strided_slice %3 {offsets = [1, 0], sizes = [4, 512], strides = [1, 1]} : vector<5x512xbf16> to vector<4x512xbf16>
    %c3 = arith.constant 3 : index
    %c0_16 = arith.constant 0 : index
    %c0_17 = arith.constant 0 : index
    %19 = vector.load %arg4[%c3, %c0_16, %c0_17] : memref<4x512x128xbf16, #tpu.memory_space<vmem>>, vector<1x512x128xbf16>
    %20 = vector.shape_cast %19 : vector<1x512x128xbf16> to vector<512x128xbf16>
    %cst_18 = arith.constant dense<0.000000e+00> : vector<4x128xf32>
    %21 = tpu.matmul %18, %20, %cst_18 {dimension_numbers = #tpu.dot_dimension_numbers<[1], [0], [0], [1], [0, 0, 1, 1], [], []>} : vector<4x512xbf16>, vector<512x128xbf16>, vector<4x128xf32> -> vector<4x128xf32>
    %22 = arith.addf %17, %21 : vector<4x128xf32>
    %cst_19 = arith.constant 0.000000e+00 : f32
    %23 = vector.broadcast %cst_19 : f32 to vector<4x128xf32>
    %24 = arith.cmpf oge, %22, %23 : vector<4x128xf32>
    %cst_20 = arith.constant 2.000000e-01 : f32
    %25 = vector.broadcast %cst_20 : f32 to vector<4x128xf32>
    %26 = arith.mulf %22, %25 : vector<4x128xf32>
    %27 = arith.select %24, %22, %26 : vector<4x128xi1>, vector<4x128xf32>
    %28 = arith.truncf %27 : vector<4x128xf32> to vector<4x128xbf16>
    %c0_21 = arith.constant 0 : index
    %c0_22 = arith.constant 0 : index
    %c0_23 = arith.constant 0 : index
    %c0_24 = arith.constant 0 : index
    %29 = vector.load %arg5[%c0_21, %c0_22, %c0_23, %c0_24] : memref<1x1x4x128xbf16, #tpu.memory_space<vmem>>, vector<1x1x4x128xbf16>
    %30 = vector.shape_cast %29 : vector<1x1x4x128xbf16> to vector<4x128xbf16>
    %31 = vector.shape_cast %28 : vector<4x128xbf16> to vector<1x1x4x128xbf16>
    tpu.vector_store %arg5[%c0_21, %c0_22, %c0_23, %c0_24], %31 {strides = array<i32>} : memref<1x1x4x128xbf16, #tpu.memory_space<vmem>>, vector<1x1x4x128xbf16>,
    return
  }
  func.func @transform_0(%arg0: i32, %arg1: i32) -> (i32, i32, i32, i32) {
    %c0_i32 = arith.constant 0 : i32
    %c0_i32_0 = arith.constant 0 : i32
    %c0_i32_1 = arith.constant 0 : i32
    return %arg0, %arg1, %c0_i32, %c0_i32_0 : i32, i32, i32, i32
  }
  func.func @transform_1(%arg0: i32, %arg1: i32) -> (i32, i32, i32, i32) {
    %c1_i32 = arith.constant 1 : i32
    %0 = arith.addi %arg1, %c1_i32 : i32
    %c0_i32 = arith.constant 0 : i32
    %c0_i32_0 = arith.constant 0 : i32
    %c0_i32_1 = arith.constant 0 : i32
    return %arg0, %0, %c0_i32, %c0_i32_0 : i32, i32, i32, i32
  }
  func.func @transform_2(%arg0: i32, %arg1: i32) -> (i32, i32, i32) {
    %c0_i32 = arith.constant 0 : i32
    %c0_i32_0 = arith.constant 0 : i32
    %c0_i32_1 = arith.constant 0 : i32
    %c0_i32_2 = arith.constant 0 : i32
    return %c0_i32, %c0_i32_0, %c0_i32_1 : i32, i32, i32
  }
  func.func @transform_3(%arg0: i32, %arg1: i32) -> (i32, i32, i32, i32) {
    %c0_i32 = arith.constant 0 : i32
    %c0_i32_0 = arith.constant 0 : i32
    %c0_i32_1 = arith.constant 0 : i32
    return %arg0, %arg1, %c0_i32, %c0_i32_0 : i32, i32, i32, i32
  }
}

module attributes {stable_mosaic.version = 11 : i64} {
  func.func @_conv_tap_kernel(%arg0: i32, %arg1: i32, %arg2: memref<1x1x3x512xbf16, #tpu.memory_space<vmem>>, %arg3: memref<1x1x3x512xbf16, #tpu.memory_space<vmem>>, %arg4: memref<4x512x128xbf16, #tpu.memory_space<vmem>>, %arg5: memref<1x1x2x128xbf16, #tpu.memory_space<vmem>>) attributes {dimension_semantics = [#tpu.dimension_semantics<parallel>, #tpu.dimension_semantics<parallel>], iteration_bounds = array<i64: 2, 2>, scalar_prefetch = 0 : i64, scratch_operands = 0 : i64, tpu.core_type = #tpu.core_type<tc>, window_params = [{transform_indices = @transform_0, window_bounds = array<i64: 1, 1, 3, 512>}, {transform_indices = @transform_1, window_bounds = array<i64: 1, 1, 3, 512>}, {pipeline_mode = #tpu.pipeline_mode<synchronous>, transform_indices = @transform_2, window_bounds = array<i64: 4, 512, 128>}, {transform_indices = @transform_3, window_bounds = array<i64: 1, 1, 2, 128>}]} {
    %c0 = arith.constant 0 : index
    %c0_0 = arith.constant 0 : index
    %c0_1 = arith.constant 0 : index
    %c0_2 = arith.constant 0 : index
    %0 = vector.load %arg2[%c0, %c0_0, %c0_1, %c0_2] : memref<1x1x3x512xbf16, #tpu.memory_space<vmem>>, vector<1x1x3x512xbf16>
    %1 = vector.shape_cast %0 : vector<1x1x3x512xbf16> to vector<3x512xbf16>
    %c0_3 = arith.constant 0 : index
    %c0_4 = arith.constant 0 : index
    %c0_5 = arith.constant 0 : index
    %c0_6 = arith.constant 0 : index
    %2 = vector.load %arg3[%c0_3, %c0_4, %c0_5, %c0_6] : memref<1x1x3x512xbf16, #tpu.memory_space<vmem>>, vector<1x1x3x512xbf16>
    %3 = vector.shape_cast %2 : vector<1x1x3x512xbf16> to vector<3x512xbf16>
    %4 = vector.extract_strided_slice %1 {offsets = [0, 0], sizes = [2, 512], strides = [1, 1]} : vector<3x512xbf16> to vector<2x512xbf16>
    %c0_7 = arith.constant 0 : index
    %c0_8 = arith.constant 0 : index
    %c0_9 = arith.constant 0 : index
    %5 = vector.load %arg4[%c0_7, %c0_8, %c0_9] : memref<4x512x128xbf16, #tpu.memory_space<vmem>>, vector<1x512x128xbf16>
    %6 = vector.shape_cast %5 : vector<1x512x128xbf16> to vector<512x128xbf16>
    %cst = arith.constant dense<0.000000e+00> : vector<2x128xf32>
    %7 = tpu.matmul %4, %6, %cst {dimension_numbers = #tpu.dot_dimension_numbers<[1], [0], [0], [1], [0, 0, 1, 1], [], []>} : vector<2x512xbf16>, vector<512x128xbf16>, vector<2x128xf32> -> vector<2x128xf32>
    %8 = vector.extract_strided_slice %1 {offsets = [1, 0], sizes = [2, 512], strides = [1, 1]} : vector<3x512xbf16> to vector<2x512xbf16>
    %c1 = arith.constant 1 : index
    %c0_10 = arith.constant 0 : index
    %c0_11 = arith.constant 0 : index
    %9 = vector.load %arg4[%c1, %c0_10, %c0_11] : memref<4x512x128xbf16, #tpu.memory_space<vmem>>, vector<1x512x128xbf16>
    %10 = vector.shape_cast %9 : vector<1x512x128xbf16> to vector<512x128xbf16>
    %cst_12 = arith.constant dense<0.000000e+00> : vector<2x128xf32>
    %11 = tpu.matmul %8, %10, %cst_12 {dimension_numbers = #tpu.dot_dimension_numbers<[1], [0], [0], [1], [0, 0, 1, 1], [], []>} : vector<2x512xbf16>, vector<512x128xbf16>, vector<2x128xf32> -> vector<2x128xf32>
    %12 = arith.addf %7, %11 : vector<2x128xf32>
    %13 = vector.extract_strided_slice %3 {offsets = [0, 0], sizes = [2, 512], strides = [1, 1]} : vector<3x512xbf16> to vector<2x512xbf16>
    %c2 = arith.constant 2 : index
    %c0_13 = arith.constant 0 : index
    %c0_14 = arith.constant 0 : index
    %14 = vector.load %arg4[%c2, %c0_13, %c0_14] : memref<4x512x128xbf16, #tpu.memory_space<vmem>>, vector<1x512x128xbf16>
    %15 = vector.shape_cast %14 : vector<1x512x128xbf16> to vector<512x128xbf16>
    %cst_15 = arith.constant dense<0.000000e+00> : vector<2x128xf32>
    %16 = tpu.matmul %13, %15, %cst_15 {dimension_numbers = #tpu.dot_dimension_numbers<[1], [0], [0], [1], [0, 0, 1, 1], [], []>} : vector<2x512xbf16>, vector<512x128xbf16>, vector<2x128xf32> -> vector<2x128xf32>
    %17 = arith.addf %12, %16 : vector<2x128xf32>
    %18 = vector.extract_strided_slice %3 {offsets = [1, 0], sizes = [2, 512], strides = [1, 1]} : vector<3x512xbf16> to vector<2x512xbf16>
    %c3 = arith.constant 3 : index
    %c0_16 = arith.constant 0 : index
    %c0_17 = arith.constant 0 : index
    %19 = vector.load %arg4[%c3, %c0_16, %c0_17] : memref<4x512x128xbf16, #tpu.memory_space<vmem>>, vector<1x512x128xbf16>
    %20 = vector.shape_cast %19 : vector<1x512x128xbf16> to vector<512x128xbf16>
    %cst_18 = arith.constant dense<0.000000e+00> : vector<2x128xf32>
    %21 = tpu.matmul %18, %20, %cst_18 {dimension_numbers = #tpu.dot_dimension_numbers<[1], [0], [0], [1], [0, 0, 1, 1], [], []>} : vector<2x512xbf16>, vector<512x128xbf16>, vector<2x128xf32> -> vector<2x128xf32>
    %22 = arith.addf %17, %21 : vector<2x128xf32>
    %cst_19 = arith.constant 0.000000e+00 : f32
    %23 = vector.broadcast %cst_19 : f32 to vector<2x128xf32>
    %24 = arith.cmpf oge, %22, %23 : vector<2x128xf32>
    %cst_20 = arith.constant 2.000000e-01 : f32
    %25 = vector.broadcast %cst_20 : f32 to vector<2x128xf32>
    %26 = arith.mulf %22, %25 : vector<2x128xf32>
    %27 = arith.select %24, %22, %26 : vector<2x128xi1>, vector<2x128xf32>
    %28 = arith.truncf %27 : vector<2x128xf32> to vector<2x128xbf16>
    %c0_21 = arith.constant 0 : index
    %c0_22 = arith.constant 0 : index
    %c0_23 = arith.constant 0 : index
    %c0_24 = arith.constant 0 : index
    %29 = vector.load %arg5[%c0_21, %c0_22, %c0_23, %c0_24] : memref<1x1x2x128xbf16, #tpu.memory_space<vmem>>, vector<1x1x2x128xbf16>
    %30 = vector.shape_cast %29 : vector<1x1x2x128xbf16> to vector<2x128xbf16>
    %31 = vector.shape_cast %28 : vector<2x128xbf16> to vector<1x1x2x128xbf16>
    tpu.vector_store %arg5[%c0_21, %c0_22, %c0_23, %c0_24], %31 {strides = array<i32>} : memref<1x1x2x128xbf16, #tpu.memory_space<vmem>>, vector<1x1x2x128xbf16>,
    return
  }
  func.func @transform_0(%arg0: i32, %arg1: i32) -> (i32, i32, i32, i32) {
    %c0_i32 = arith.constant 0 : i32
    %c0_i32_0 = arith.constant 0 : i32
    %c0_i32_1 = arith.constant 0 : i32
    return %arg0, %arg1, %c0_i32, %c0_i32_0 : i32, i32, i32, i32
  }
  func.func @transform_1(%arg0: i32, %arg1: i32) -> (i32, i32, i32, i32) {
    %c1_i32 = arith.constant 1 : i32
    %0 = arith.addi %arg1, %c1_i32 : i32
    %c0_i32 = arith.constant 0 : i32
    %c0_i32_0 = arith.constant 0 : i32
    %c0_i32_1 = arith.constant 0 : i32
    return %arg0, %0, %c0_i32, %c0_i32_0 : i32, i32, i32, i32
  }
  func.func @transform_2(%arg0: i32, %arg1: i32) -> (i32, i32, i32) {
    %c0_i32 = arith.constant 0 : i32
    %c0_i32_0 = arith.constant 0 : i32
    %c0_i32_1 = arith.constant 0 : i32
    %c0_i32_2 = arith.constant 0 : i32
    return %c0_i32, %c0_i32_0, %c0_i32_1 : i32, i32, i32
  }
  func.func @transform_3(%arg0: i32, %arg1: i32) -> (i32, i32, i32, i32) {
    %c0_i32 = arith.constant 0 : i32
    %c0_i32_0 = arith.constant 0 : i32
    %c0_i32_1 = arith.constant 0 : i32
    return %arg0, %arg1, %c0_i32, %c0_i32_0 : i32, i32, i32, i32
  }
}

module attributes {stable_mosaic.version = 11 : i64} {
  func.func @_conv_fc_kernel(%arg0: i32, %arg1: memref<1x1x2x512xbf16, #tpu.memory_space<vmem>>, %arg2: memref<1x1x2x512xbf16, #tpu.memory_space<vmem>>, %arg3: memref<4x512x128xbf16, #tpu.memory_space<vmem>>, %arg4: memref<128x128xf32, #tpu.memory_space<vmem>>, %arg5: memref<1x128xf32, #tpu.memory_space<vmem>>, %arg6: memref<1x1x128xf32, #tpu.memory_space<vmem>>) attributes {dimension_semantics = [#tpu.dimension_semantics<parallel>], iteration_bounds = array<i64: 2>, scalar_prefetch = 0 : i64, scratch_operands = 0 : i64, tpu.core_type = #tpu.core_type<tc>, window_params = [{transform_indices = @transform_0, window_bounds = array<i64: 1, 1, 2, 512>}, {transform_indices = @transform_1, window_bounds = array<i64: 1, 1, 2, 512>}, {pipeline_mode = #tpu.pipeline_mode<synchronous>, transform_indices = @transform_2, window_bounds = array<i64: 4, 512, 128>}, {pipeline_mode = #tpu.pipeline_mode<synchronous>, transform_indices = @transform_3, window_bounds = array<i64: 128, 128>}, {pipeline_mode = #tpu.pipeline_mode<synchronous>, transform_indices = @transform_4, window_bounds = array<i64: 1, 128>}, {transform_indices = @transform_5, window_bounds = array<i64: 1, 1, 128>}]} {
    %c0 = arith.constant 0 : index
    %c0_0 = arith.constant 0 : index
    %c0_1 = arith.constant 0 : index
    %c0_2 = arith.constant 0 : index
    %0 = vector.load %arg1[%c0, %c0_0, %c0_1, %c0_2] : memref<1x1x2x512xbf16, #tpu.memory_space<vmem>>, vector<1x1x2x512xbf16>
    %1 = vector.shape_cast %0 : vector<1x1x2x512xbf16> to vector<2x512xbf16>
    %c0_3 = arith.constant 0 : index
    %c0_4 = arith.constant 0 : index
    %c0_5 = arith.constant 0 : index
    %c0_6 = arith.constant 0 : index
    %2 = vector.load %arg2[%c0_3, %c0_4, %c0_5, %c0_6] : memref<1x1x2x512xbf16, #tpu.memory_space<vmem>>, vector<1x1x2x512xbf16>
    %3 = vector.shape_cast %2 : vector<1x1x2x512xbf16> to vector<2x512xbf16>
    %4 = vector.extract_strided_slice %1 {offsets = [0, 0], sizes = [1, 512], strides = [1, 1]} : vector<2x512xbf16> to vector<1x512xbf16>
    %c0_7 = arith.constant 0 : index
    %c0_8 = arith.constant 0 : index
    %c0_9 = arith.constant 0 : index
    %5 = vector.load %arg3[%c0_7, %c0_8, %c0_9] : memref<4x512x128xbf16, #tpu.memory_space<vmem>>, vector<1x512x128xbf16>
    %6 = vector.shape_cast %5 : vector<1x512x128xbf16> to vector<512x128xbf16>
    %cst = arith.constant dense<0.000000e+00> : vector<1x128xf32>
    %7 = tpu.matmul %4, %6, %cst {dimension_numbers = #tpu.dot_dimension_numbers<[1], [0], [0], [1], [0, 0, 1, 1], [], []>} : vector<1x512xbf16>, vector<512x128xbf16>, vector<1x128xf32> -> vector<1x128xf32>
    %8 = vector.extract_strided_slice %1 {offsets = [1, 0], sizes = [1, 512], strides = [1, 1]} : vector<2x512xbf16> to vector<1x512xbf16>
    %c1 = arith.constant 1 : index
    %c0_10 = arith.constant 0 : index
    %c0_11 = arith.constant 0 : index
    %9 = vector.load %arg3[%c1, %c0_10, %c0_11] : memref<4x512x128xbf16, #tpu.memory_space<vmem>>, vector<1x512x128xbf16>
    %10 = vector.shape_cast %9 : vector<1x512x128xbf16> to vector<512x128xbf16>
    %cst_12 = arith.constant dense<0.000000e+00> : vector<1x128xf32>
    %11 = tpu.matmul %8, %10, %cst_12 {dimension_numbers = #tpu.dot_dimension_numbers<[1], [0], [0], [1], [0, 0, 1, 1], [], []>} : vector<1x512xbf16>, vector<512x128xbf16>, vector<1x128xf32> -> vector<1x128xf32>
    %12 = arith.addf %7, %11 : vector<1x128xf32>
    %13 = vector.extract_strided_slice %3 {offsets = [0, 0], sizes = [1, 512], strides = [1, 1]} : vector<2x512xbf16> to vector<1x512xbf16>
    %c2 = arith.constant 2 : index
    %c0_13 = arith.constant 0 : index
    %c0_14 = arith.constant 0 : index
    %14 = vector.load %arg3[%c2, %c0_13, %c0_14] : memref<4x512x128xbf16, #tpu.memory_space<vmem>>, vector<1x512x128xbf16>
    %15 = vector.shape_cast %14 : vector<1x512x128xbf16> to vector<512x128xbf16>
    %cst_15 = arith.constant dense<0.000000e+00> : vector<1x128xf32>
    %16 = tpu.matmul %13, %15, %cst_15 {dimension_numbers = #tpu.dot_dimension_numbers<[1], [0], [0], [1], [0, 0, 1, 1], [], []>} : vector<1x512xbf16>, vector<512x128xbf16>, vector<1x128xf32> -> vector<1x128xf32>
    %17 = arith.addf %12, %16 : vector<1x128xf32>
    %18 = vector.extract_strided_slice %3 {offsets = [1, 0], sizes = [1, 512], strides = [1, 1]} : vector<2x512xbf16> to vector<1x512xbf16>
    %c3 = arith.constant 3 : index
    %c0_16 = arith.constant 0 : index
    %c0_17 = arith.constant 0 : index
    %19 = vector.load %arg3[%c3, %c0_16, %c0_17] : memref<4x512x128xbf16, #tpu.memory_space<vmem>>, vector<1x512x128xbf16>
    %20 = vector.shape_cast %19 : vector<1x512x128xbf16> to vector<512x128xbf16>
    %cst_18 = arith.constant dense<0.000000e+00> : vector<1x128xf32>
    %21 = tpu.matmul %18, %20, %cst_18 {dimension_numbers = #tpu.dot_dimension_numbers<[1], [0], [0], [1], [0, 0, 1, 1], [], []>} : vector<1x512xbf16>, vector<512x128xbf16>, vector<1x128xf32> -> vector<1x128xf32>
    %22 = arith.addf %17, %21 : vector<1x128xf32>
    %cst_19 = arith.constant 0.000000e+00 : f32
    %23 = vector.broadcast %cst_19 : f32 to vector<1x128xf32>
    %24 = arith.cmpf oge, %22, %23 : vector<1x128xf32>
    %cst_20 = arith.constant 2.000000e-01 : f32
    %25 = vector.broadcast %cst_20 : f32 to vector<1x128xf32>
    %26 = arith.mulf %22, %25 : vector<1x128xf32>
    %27 = arith.select %24, %22, %26 : vector<1x128xi1>, vector<1x128xf32>
    %c0_21 = arith.constant 0 : index
    %c0_22 = arith.constant 0 : index
    %28 = vector.load %arg4[%c0_21, %c0_22] : memref<128x128xf32, #tpu.memory_space<vmem>>, vector<128x128xf32>
    %cst_23 = arith.constant dense<0.000000e+00> : vector<1x128xf32>
    %29 = tpu.matmul %27, %28, %cst_23 {dimension_numbers = #tpu.dot_dimension_numbers<[1], [0], [0], [1], [0, 0, 1, 1], [], []>} : vector<1x128xf32>, vector<128x128xf32>, vector<1x128xf32> -> vector<1x128xf32>
    %c0_24 = arith.constant 0 : index
    %c0_25 = arith.constant 0 : index
    %30 = vector.load %arg5[%c0_24, %c0_25] : memref<1x128xf32, #tpu.memory_space<vmem>>, vector<1x128xf32>
    %31 = arith.addf %29, %30 : vector<1x128xf32>
    %c0_26 = arith.constant 0 : index
    %c0_27 = arith.constant 0 : index
    %c0_28 = arith.constant 0 : index
    %32 = vector.load %arg6[%c0_26, %c0_27, %c0_28] : memref<1x1x128xf32, #tpu.memory_space<vmem>>, vector<1x1x128xf32>
    %33 = vector.shape_cast %32 : vector<1x1x128xf32> to vector<1x128xf32>
    %34 = vector.shape_cast %31 : vector<1x128xf32> to vector<1x1x128xf32>
    tpu.vector_store %arg6[%c0_26, %c0_27, %c0_28], %34 {strides = array<i32>} : memref<1x1x128xf32, #tpu.memory_space<vmem>>, vector<1x1x128xf32>,
    return
  }
  func.func @transform_0(%arg0: i32) -> (i32, i32, i32, i32) {
    %c0_i32 = arith.constant 0 : i32
    %c0_i32_0 = arith.constant 0 : i32
    %c0_i32_1 = arith.constant 0 : i32
    %c0_i32_2 = arith.constant 0 : i32
    return %arg0, %c0_i32, %c0_i32_0, %c0_i32_1 : i32, i32, i32, i32
  }
  func.func @transform_1(%arg0: i32) -> (i32, i32, i32, i32) {
    %c1_i32 = arith.constant 1 : i32
    %c0_i32 = arith.constant 0 : i32
    %c0_i32_0 = arith.constant 0 : i32
    %c0_i32_1 = arith.constant 0 : i32
    return %arg0, %c1_i32, %c0_i32, %c0_i32_0 : i32, i32, i32, i32
  }
  func.func @transform_2(%arg0: i32) -> (i32, i32, i32) {
    %c0_i32 = arith.constant 0 : i32
    %c0_i32_0 = arith.constant 0 : i32
    %c0_i32_1 = arith.constant 0 : i32
    %c0_i32_2 = arith.constant 0 : i32
    return %c0_i32, %c0_i32_0, %c0_i32_1 : i32, i32, i32
  }
  func.func @transform_3(%arg0: i32) -> (i32, i32) {
    %c0_i32 = arith.constant 0 : i32
    %c0_i32_0 = arith.constant 0 : i32
    %c0_i32_1 = arith.constant 0 : i32
    return %c0_i32, %c0_i32_0 : i32, i32
  }
  func.func @transform_4(%arg0: i32) -> (i32, i32) {
    %c0_i32 = arith.constant 0 : i32
    %c0_i32_0 = arith.constant 0 : i32
    %c0_i32_1 = arith.constant 0 : i32
    return %c0_i32, %c0_i32_0 : i32, i32
  }
  func.func @transform_5(%arg0: i32) -> (i32, i32, i32) {
    %c0_i32 = arith.constant 0 : i32
    %c0_i32_0 = arith.constant 0 : i32
    %c0_i32_1 = arith.constant 0 : i32
    return %arg0, %c0_i32, %c0_i32_0 : i32, i32, i32
  }
}

</mosaic_0001>

<bundles_post_ra>
// kernel: discriminator_linear_forward.4
= control target key start
LH: loop header
LB: loop body
LE: loop exit
PB: predicated region body
PF: predicated region fallthrough
CT: control target
= control target key end

     0   :  { %s1172_s12 = smov 0   ;;  %s1174_s13 = smov 0   ;;  %s1389_s0 = inlined_call_operand.vmem [shape: bf16[2,9,9,128], index: 0, kind: input, shape index: {}, may-alias: {0,1}]   ;;  %s1390_s1 = inlined_call_operand.vmem [shape: bf16[2,9,9,128], index: 1, kind: input, shape index: {}, may-alias: {0,1}]   ;;  %s1391_s2 = inlined_call_operand.vmem [shape: bf16[4,128,128], index: 2, kind: input, shape index: {}]   ;;  %s1392_s3 = inlined_call_operand.vmem [shape: bf16[2,8,8,128], index: 3, kind: output, shape index: {}]  }
   0x1   :  { %s1176_s14 = smov 0   ;;  %s1178_s15 = smov 0  }
   0x2   :  { %s1180_s16 = smov 0  }
   0x3 LB: > { %s22_s17 = sadd.s32 1, %s1140_s14  ;;  %s25_s18 = sadd.s32 1, %s1144_s15  ;;  %s1148_s16 = sphi %s1180_s16, %s13_s16   ;;  %s1144_s15 = sphi %s1178_s15, %s1396_s15   ;;  %s1140_s14 = sphi %s1176_s14, %s1395_s14   ;;  %s1136_s13 = sphi %s1174_s13, %s1394_s13   ;;  %s1132_s12 = sphi %s1172_s12, %s1393_s12  }
   0x4   : > { %p23_p0 = scmp.ge.s32.totalorder %s22_s17, 8  ;;  %p817_p1 = scmp.ge.s32.totalorder %s1148_s16, 1 }
   0x5   : > { %p177_p2 = scmp.lt.s32.totalorder %s1148_s16, 17 }
   0x6   : > { %s1398_s17 = smov (%p23_p0, %s22_s17), 0  ;;  %s1400_s18 = smov (!%p23_p0, %s25_s18), %s1144_s15 }
   0x7   : > { %p178_p3 = pnand %p817_p1, %p177_p2  ;;  %p27_p4 = scmp.ge.s32.totalorder %s1400_s18, 2 }
   0x8   : > { %v1076_v0 = vld [vmem:[%s1391_s2 + $0x40] sm:$0xff] (!%p178_p3)   ;;  %v1150_v1 = vmov (!%p178_p3), 0.0   ;;  %v1078_v3 = vld [vmem:[%s1391_s2 + $0x48] sm:$0xff] (!%p178_p3)   ;;  %vm1151_vm0 = vmmov (!%p178_p3), 0   ;;  %p218_p5 = scmp.lt.s32.totalorder (!%p178_p3), %s1136_s13, 1  ;;  %p220_p6 = scmp.lt.s32.totalorder (!%p178_p3), %s1132_s12, 8 }
   0x9   : > { %s1402_s18 = smov (%p27_p4, %s1400_s18), 0  ;;  %181 = sbr.rel (%p178_p3) target bundleno = 295 (0x127), region = 32 }
   0xa   : > { %944 = vmatprep.subr.bf16.mxu1 (!%p178_p3), %v1150_v1  ;;  %984 = vmatprep.subr.bf16.mxu0 (!%p178_p3), %v1150_v1  ;;  %v1077_v2 = vld [vmem:[%s1391_s2 + $0x80] sm:$0xff] (!%p178_p3)   ;;  %v1079_v4 = vld [vmem:[%s1391_s2 + $0x88] sm:$0xff] (!%p178_p3)   ;;  %v1080_v5 = vld [vmem:[%s1391_s2 + $0x50] sm:$0xff] (!%p178_p3)   ;;  %s227_s8 = sadd.s32 (!%p178_p3), 1, %s1132_s12  ;;  %p240_p8 = scmp.lt.s32.totalorder (!%p178_p3), %s1132_s12, 7 }
   0xb   : > { %945 = vmatpush3.bf16.msra.mxu1 (!%p178_p3), %v1076_v0  ;;  %960 = vmatprep.mubr.msk.bf16.mxu1 (!%p178_p3), %vm1151_vm0, %v1150_v1  ;;  %v1081_v6 = vld [vmem:[%s1391_s2 + $0x90] sm:$0xff] (!%p178_p3)   ;;  %v1082_v7 = vld [vmem:[%s1391_s2 + $0x58] sm:$0xff] (!%p178_p3)   ;;  %p230_p7 = scmp.lt.s32.totalorder (!%p178_p3), %s227_s8, 8  ;;  %v1084_v9 = vld [vmem:[%s1391_s2 + $0x60] sm:$0xff] (!%p178_p3)  }
   0xc   : > { %985 = vmatpush3.bf16.msra.mxu0 (!%p178_p3), %v1077_v2  ;;  %946 = vmatprep.subr.bf16.mxu1 (!%p178_p3), %v1150_v1  ;;  %v1083_v8 = vld [vmem:[%s1391_s2 + $0x98] sm:$0xff] (!%p178_p3)   ;;  %v1085_v10 = vld [vmem:[%s1391_s2 + $0xa0] sm:$0xff] (!%p178_p3)   ;;  %v1086_v14 = vld [vmem:[%s1391_s2 + $0x68] sm:$0xff] (!%p178_p3)  }
   0xd   : > { %986 = vmatprep.subr.bf16.mxu0 (!%p178_p3), %v1150_v1  ;;  %1000 = vmatprep.mubr.msk.bf16.mxu0 (!%p178_p3), %vm1151_vm0, %v1150_v1  ;;  %v1087_v15 = vld [vmem:[%s1391_s2 + $0xa8] sm:$0xff] (!%p178_p3)   ;;  %v1088_v17 = vld [vmem:[%s1391_s2 + $0x70] sm:$0xff] (!%p178_p3)   ;;  %v1090_v21 = vld [vmem:[%s1391_s2 + $0x78] sm:$0xff] (!%p178_p3)  }
   0xe   : > { %v1089_v18 = vld [vmem:[%s1391_s2 + $0xb0] sm:$0xff] (!%p178_p3)   ;;  %v1091_v22 = vld [vmem:[%s1391_s2 + $0xb8] sm:$0xff] (!%p178_p3)   ;;  %v1093_v24 = vld [vmem:[%s1391_s2] sm:$0xff] (!%p178_p3)  }
   0xf   : > { %947 = vmatpush3.bf16.msra.mxu1 (!%p178_p3), %v1078_v3  ;;  %v1095_v25 = vld [vmem:[%s1391_s2 + $0xc0] sm:$0xff] (!%p178_p3)   ;;  %v1096_v27 = vld [vmem:[%s1391_s2 + $0x8] sm:$0xff] (!%p178_p3)   ;;  %v1098_v29 = vld [vmem:[%s1391_s2 + $0x10] sm:$0xff] (!%p178_p3)  }
  0x10   : > { %s1404_s13 = smov (!%p218_p5, %s1136_s13), 1  ;;  %987 = vmatpush3.bf16.msra.mxu0 %v1079_v4  ;;  %948 = vmatprep.subr.bf16.mxu1 %v1150_v1  ;;  %s1406_s8 = smov (!%p230_p7, %s227_s8), 8  ;;  %v1097_v28 = vld [vmem:[%s1391_s2 + $0xc8] sm:$0xff]   ;;  %v1099_v30 = vld [vmem:[%s1391_s2 + $0xd0] sm:$0xff]   ;;  %v1100_v31 = vld [vmem:[%s1391_s2 + $0x18] sm:$0xff]  }
  0x11   : > { %s221_s27 = scalar_select %p220_p6, %s1132_s12, 8  ;;  %988 = vmatprep.subr.bf16.mxu0 %v1150_v1  ;;  %v1101_v32 = vld [vmem:[%s1391_s2 + $0xd8] sm:$0xff]   ;;  %v1102_v33 = vld [vmem:[%s1391_s2 + $0x20] sm:$0xff]   ;;  %v1104_v37 = vld [vmem:[%s1391_s2 + $0x28] sm:$0xff]  }
  0x12   : > { %s1033_s30 = smul.u32 18, %s1404_s13  ;;  %s820_s4 = sshll.u32 %s1406_s8, 1  ;;  %v1103_v35 = vld [vmem:[%s1391_s2 + $0xe0] sm:$0xff]   ;;  %v1105_v38 = vld [vmem:[%s1391_s2 + $0xe8] sm:$0xff]   ;;  %v1106_v40 = vld [vmem:[%s1391_s2 + $0x30] sm:$0xff]  }
  0x13   : > { %s818_s6 = sshll.u32 %s221_s27, 1  ;;  %949 = vmatpush3.bf16.msra.mxu1 %v1080_v5  ;;  %v1107_v41 = vld [vmem:[%s1391_s2 + $0xf0] sm:$0xff]   ;;  %v1108_v44 = vld [vmem:[%s1391_s2 + $0x38] sm:$0xff]   ;;  %s1408_s12 = smov (!%p240_p8, %s1132_s12), 7 }
  0x14   : > { %s224_s7 = sadd.s32 %s1033_s30, %s818_s6  ;;  %989 = vmatpush3.bf16.msra.mxu0 %v1081_v6  ;;  %950 = vmatprep.subr.bf16.mxu1 %v1150_v1  ;;  %v1109_v45 = vld [vmem:[%s1391_s2 + $0xf8] sm:$0xff]  }
  0x15   : > { %s819_s11 = sshll.u32 %s224_s7, 2  ;;  %990 = vmatprep.subr.bf16.mxu0 %v1150_v1  ;;  %s234_s7 = sadd.s32 %s1033_s30, %s820_s4 }
  0x16   : > { %s226_s23 = scalar_lea.vmem %s1389_s0, %s819_s11  ;;  %s821_s8 = sshll.u32 %s234_s7, 2 }
  0x17   : > { %951 = vmatpush3.bf16.msra.mxu1 %v1082_v7  ;;  %v1263_v11 = vld [vmem:[%s226_s23] sm:$0xf]  ;;  %v248_v12 = vld [vmem:[%s226_s23 + $0x4] sm:$0x1]  ;;  %s1295_s25 = scalar_lea.vmem %s1390_s1, %s821_s8  ;;  %s822_s8 = sshll.u32 %s1404_s13, 3 }
  0x18   : > { %991 = vmatpush3.bf16.msra.mxu0 %v1083_v8  ;;  %952 = vmatprep.subr.bf16.mxu1 %v1150_v1  ;;  %v840_v13 = vcombine.low %v1263_v11, %v248_v12  ;;  %v249_v26 = vld [vmem:[%s1295_s25] sm:$0xf]  ;;  %v250_v34 = vld [vmem:[%s1295_s25 + $0x4] sm:$0x1]  ;;  %s243_s20 = sadd.s32 %s822_s8, %s1408_s12 }
  0x19   : > { %992 = vmatprep.subr.bf16.mxu0 %v1150_v1  ;;  %v897_v36 = vcombine.low %v249_v26, %v250_v34  ;;  %s823_s30 = sshll.u32 %s243_s20, 2 }
  0x1a   : > { %v292_v16 = vshll.u32 %v840_v13, 16  ;;  %v290_v19 = vshrl.u32 %v840_v13, 16  ;;  %s245_s23 = scalar_lea.vmem %s1392_s3, %s823_s30 }
  0x1b   : > { %953 = vmatpush3.bf16.msra.mxu1 %v1084_v9  ;;  %v604_v39 = vshll.u32 %v897_v36, 16  ;;  %v602_v42 = vshrl.u32 %v897_v36, 16 }
  0x1c   : > { %993 = vmatpush3.bf16.msra.mxu0 %v1085_v10  ;;  %954 = vmatprep.subr.bf16.mxu1 %v1150_v1  ;;  %v294_v20 = vrot.slane %v292_v16, 1 }
  0x1d   : > { %994 = vmatprep.subr.bf16.mxu0 %v1150_v1  ;;  %v606_v43 = vrot.slane %v604_v39, 1 }
  0x1e   : > { %v295_v23 = vor.u32 %v294_v20, %v290_v19 }
  0x1f   : > { %955 = vmatpush3.bf16.msra.mxu1 %v1086_v14  ;;  %v607_v46 = vor.u32 %v606_v43, %v602_v42 }
  0x20   : > { %995 = vmatpush3.bf16.msra.mxu0 %v1087_v15  ;;  %956 = vmatprep.subr.bf16.mxu1 %v1150_v1 }
  0x21   : > { %996 = vmatprep.subr.bf16.mxu0 %v1150_v1 }
  0x23   : > { %957 = vmatpush3.bf16.msra.mxu1 %v1088_v17 }
  0x24   : > { %997 = vmatpush3.bf16.msra.mxu0 %v1089_v18  ;;  %958 = vmatprep.subr.bf16.mxu1 %v1150_v1 }
  0x25   : > { %998 = vmatprep.subr.bf16.mxu0 %v1150_v1 }
  0x27   : > { %959 = vmatpush3.bf16.msra.mxu1 %v1090_v21 }
  0x28   : > { %999 = vmatpush3.bf16.msra.mxu0 %v1091_v22  ;;  %964 = vmatprep.subr.bf16.mxu1 %v1150_v1 }
  0x29   : > { %1004 = vmatprep.subr.bf16.mxu0 %v1150_v1 }
  0x2a   : > { %961 = vmatmul.mubr.bf16.vlgmr.msra.gmra.mrb[0].mxu1 %v295_v23 }
  0x2b   : > { %965 = vmatpush3.bf16.msra.mxu1 %v1093_v24  ;;  %1001 = vmatmul.mubr.bf16.vlgmr.msra.gmra.mrb[0].mxu0 %v249_v26 }
  0x2c   : > { %1005 = vmatpush3.bf16.msra.mxu0 %v1095_v25  ;;  %966 = vmatprep.subr.bf16.mxu1 %v1150_v1 }
  0x2d   : > { %1006 = vmatprep.subr.bf16.mxu0 %v1150_v1  ;;  %980 = vmatprep.mubr.msk.bf16.mxu1 %vm1151_vm0, %v1150_v1 }
  0x2e   : > { %1020 = vmatprep.mubr.msk.bf16.mxu0 %vm1151_vm0, %v1150_v1 }
  0x2f   : > { %967 = vmatpush3.bf16.msra.mxu1 %v1096_v27 }
  0x30   : > { %1007 = vmatpush3.bf16.msra.mxu0 %v1097_v28  ;;  %968 = vmatprep.subr.bf16.mxu1 %v1150_v1 }
  0x31   : > { %1008 = vmatprep.subr.bf16.mxu0 %v1150_v1 }
  0x33   : > { %969 = vmatpush3.bf16.msra.mxu1 %v1098_v29 }
  0x34   : > { %1009 = vmatpush3.bf16.msra.mxu0 %v1099_v30  ;;  %970 = vmatprep.subr.bf16.mxu1 %v1150_v1 }
  0x35   : > { %1010 = vmatprep.subr.bf16.mxu0 %v1150_v1 }
  0x37   : > { %971 = vmatpush3.bf16.msra.mxu1 %v1100_v31 }
  0x38   : > { %1011 = vmatpush3.bf16.msra.mxu0 %v1101_v32  ;;  %972 = vmatprep.subr.bf16.mxu1 %v1150_v1 }
  0x39   : > { %1012 = vmatprep.subr.bf16.mxu0 %v1150_v1 }
  0x3b   : > { %973 = vmatpush3.bf16.msra.mxu1 %v1102_v33 }
  0x3c   : > { %1013 = vmatpush3.bf16.msra.mxu0 %v1103_v35  ;;  %974 = vmatprep.subr.bf16.mxu1 %v1150_v1 }
  0x3d   : > { %1014 = vmatprep.subr.bf16.mxu0 %v1150_v1 }
  0x3f   : > { %975 = vmatpush3.bf16.msra.mxu1 %v1104_v37 }
  0x40   : > { %1015 = vmatpush3.bf16.msra.mxu0 %v1105_v38  ;;  %976 = vmatprep.subr.bf16.mxu1 %v1150_v1 }
  0x41   : > { %1016 = vmatprep.subr.bf16.mxu0 %v1150_v1 }
  0x43   : > { %977 = vmatpush3.bf16.msra.mxu1 %v1106_v40 }
  0x44   : > { %1017 = vmatpush3.bf16.msra.mxu0 %v1107_v41  ;;  %978 = vmatprep.subr.bf16.mxu1 %v1150_v1 }
  0x45   : > { %1018 = vmatprep.subr.bf16.mxu0 %v1150_v1 }
  0x47   : > { %979 = vmatpush3.bf16.msra.mxu1 %v1108_v44 }
  0x48   : > { %1019 = vmatpush3.bf16.msra.mxu0 %v1109_v45 }
  0x4a   : > { %981 = vmatmul.mubr.bf16.vlgmr.msra.gmra.mrb[0].mxu1 %v1263_v11 }
  0x4b   : > { %1021 = vmatmul.mubr.bf16.vlgmr.msra.gmra.mrb[0].mxu0 %v607_v46 }
 0x11d   : > { %v467_v47 = vpop.f32.mrb[0].mxu1 }
 0x11e   : > { %v691_v48 = vpop.f32.mrb[0].mxu0  ;;  %v982_v49 = vpop.f32.mrb[1].mxu1 }
 0x11f   : > { %v1024_v50 = vadd.f32 %v691_v48, %v467_v47  ;;  %v1022_v51 = vpop.f32.mrb[1].mxu0  ;;  %v470_v52 = vpop.f32.mrb[2].mxu1 }
 0x120   : > { %v694_v53 = vpop.f32.mrb[2].mxu0  ;;  %v983_v54 = vpop.f32.mrb[3].mxu1 }
 0x121   : > { %vm698_vm1 = vcmp.ge.f32.partialorder %v1024_v50, 0.0  ;;  %v699_v55 = vmul.f32 0.2, %v1024_v50  ;;  %v1023_v56 = vpop.f32.mrb[3].mxu0 }
 0x123   : > { %v700_v57 = vsel %vm698_vm1, %v1024_v50, %v699_v55 }
 0x124   : > { %v701_v58 = vpack.c.bf16 %v700_v57, %v700_v57 }
 0x126   : > { %702 = vst [vmem:[%s245_s23] sm:$0xf] %v701_v58 }
 0x127 PF: > { %s13_s16 = sadd.s32 1, %s1148_s16   ;;  %s1393_s12 = smov %s1140_s14 }
 0x128   : > { %p10_p9 = scmp.ge.s32.totalorder %s13_s16, 18   ;;  %s1394_s13 = smov %s1144_s15 }
 0x129   : > { %s1395_s14 = smov %s1398_s17  ;;  %s1396_s15 = smov %s1402_s18 }
 0x12a   :  { %12 = sbr.rel (!%p10_p9) target bundleno = 3 (0x3), region = 68 }

// kernel: discriminator_linear_forward.5
= control target key start
LH: loop header
LB: loop body
LE: loop exit
PB: predicated region body
PF: predicated region fallthrough
CT: control target
= control target key end

     0   :  { %s2561_s12 = smov 0   ;;  %s2563_s13 = smov 0   ;;  %s3038_s0 = inlined_call_operand.vmem [shape: bf16[2,5,5,512], index: 0, kind: input, shape index: {}, may-alias: {0,1}]   ;;  %s3039_s1 = inlined_call_operand.vmem [shape: bf16[2,5,5,512], index: 1, kind: input, shape index: {}, may-alias: {0,1}]   ;;  %s3040_s2 = inlined_call_operand.vmem [shape: bf16[4,512,128], index: 2, kind: input, shape index: {}]   ;;  %s3041_s3 = inlined_call_operand.vmem [shape: bf16[2,4,4,128], index: 3, kind: output, shape index: {}]  }
   0x1   :  { %s2565_s14 = smov 0   ;;  %s2567_s15 = smov 0  }
   0x2   :  { %s2569_s16 = smov 0  }
   0x3 LB: > { %s22_s17 = sadd.s32 1, %s2531_s14  ;;  %s25_s18 = sadd.s32 1, %s2535_s15  ;;  %s2539_s16 = sphi %s2569_s16, %s13_s16   ;;  %s2535_s15 = sphi %s2567_s15, %s3045_s15   ;;  %s2531_s14 = sphi %s2565_s14, %s3044_s14   ;;  %s2527_s13 = sphi %s2563_s13, %s3043_s13   ;;  %s2523_s12 = sphi %s2561_s12, %s3042_s12  }
   0x4   : > { %p23_p0 = scmp.ge.s32.totalorder %s22_s17, 4  ;;  %p1811_p1 = scmp.ge.s32.totalorder %s2539_s16, 1 }
   0x5   : > { %p177_p2 = scmp.lt.s32.totalorder %s2539_s16, 9 }
   0x6   : > { %s3047_s17 = smov (%p23_p0, %s22_s17), 0  ;;  %s3049_s18 = smov (!%p23_p0, %s25_s18), %s2535_s15 }
   0x7   : > { %p178_p3 = pnand %p1811_p1, %p177_p2  ;;  %p27_p4 = scmp.ge.s32.totalorder %s3049_s18, 2 }
   0x8   : > { %v2365_v0 = vld [vmem:[%s3040_s2 + $0x140] sm:$0xff] (!%p178_p3)   ;;  %v2369_v4 = vld [vmem:[%s3040_s2 + $0x148] sm:$0xff] (!%p178_p3)   ;;  %v2373_v8 = vld [vmem:[%s3040_s2 + $0x150] sm:$0xff] (!%p178_p3)   ;;  %p218_p5 = scmp.lt.s32.totalorder (!%p178_p3), %s2527_s13, 1  ;;  %p220_p6 = scmp.lt.s32.totalorder (!%p178_p3), %s2523_s12, 4 }
   0x9   : > { %s3051_s18 = smov (%p27_p4, %s3049_s18), 0  ;;  %181 = sbr.rel (%p178_p3) target bundleno = 365 (0x16d), region = 32 }
   0xa   : > { %v2366_v1 = vld [vmem:[%s3040_s2 + $0x1c0] sm:$0xff] (!%p178_p3)   ;;  %2148 = vmatprep.subr.bf16.mxu0 (!%p178_p3), %v2365_v0  ;;  %v2370_v5 = vld [vmem:[%s3040_s2 + $0x1c8] sm:$0xff] (!%p178_p3)   ;;  %v2374_v9 = vld [vmem:[%s3040_s2 + $0x1d0] sm:$0xff] (!%p178_p3)   ;;  %s227_s11 = sadd.s32 (!%p178_p3), 1, %s2523_s12  ;;  %p240_p8 = scmp.lt.s32.totalorder (!%p178_p3), %s2523_s12, 3 }
   0xb   : > { %v2367_v2 = vld [vmem:[%s3040_s2 + $0x100] sm:$0xff] (!%p178_p3)   ;;  %2170 = vmatprep.subr.bf16.mxu1 (!%p178_p3), %v2366_v1  ;;  %v2371_v6 = vld [vmem:[%s3040_s2 + $0x108] sm:$0xff] (!%p178_p3)   ;;  %v2375_v10 = vld [vmem:[%s3040_s2 + $0x110] sm:$0xff] (!%p178_p3)   ;;  %p230_p7 = scmp.lt.s32.totalorder (!%p178_p3), %s227_s11, 4 }
   0xc   : > { %v2368_v3 = vld [vmem:[%s3040_s2 + $0x180] sm:$0xff] (!%p178_p3)   ;;  %2149 = vmatpush3.bf16.msra.mxu0 (!%p178_p3), %v2367_v2  ;;  %v2372_v7 = vld [vmem:[%s3040_s2 + $0x188] sm:$0xff] (!%p178_p3)   ;;  %v2376_v11 = vld [vmem:[%s3040_s2 + $0x190] sm:$0xff] (!%p178_p3)  }
   0xd   : > { %2171 = vmatpush3.bf16.msra.mxu1 (!%p178_p3), %v2368_v3  ;;  %2150 = vmatprep.subr.bf16.mxu0 (!%p178_p3), %v2369_v4  ;;  %v2377_v12 = vld [vmem:[%s3040_s2 + $0x158] sm:$0xff] (!%p178_p3)   ;;  %v2381_v16 = vld [vmem:[%s3040_s2 + $0x160] sm:$0xff] (!%p178_p3)   ;;  %v2385_v20 = vld [vmem:[%s3040_s2 + $0x168] sm:$0xff] (!%p178_p3)  }
   0xe   : > { %2172 = vmatprep.subr.bf16.mxu1 (!%p178_p3), %v2370_v5  ;;  %v2378_v13 = vld [vmem:[%s3040_s2 + $0x1d8] sm:$0xff] (!%p178_p3)   ;;  %v2382_v17 = vld [vmem:[%s3040_s2 + $0x1e0] sm:$0xff] (!%p178_p3)   ;;  %v2386_v21 = vld [vmem:[%s3040_s2 + $0x1e8] sm:$0xff] (!%p178_p3)  }
   0xf   : > { %v2379_v14 = vld [vmem:[%s3040_s2 + $0x118] sm:$0xff] (!%p178_p3)   ;;  %v2383_v18 = vld [vmem:[%s3040_s2 + $0x120] sm:$0xff] (!%p178_p3)   ;;  %v2387_v22 = vld [vmem:[%s3040_s2 + $0x128] sm:$0xff] (!%p178_p3)  }
  0x10   : > { %2151 = vmatpush3.bf16.msra.mxu0 %v2371_v6  ;;  %v2380_v15 = vld [vmem:[%s3040_s2 + $0x198] sm:$0xff]   ;;  %s3053_s13 = smov (!%p218_p5, %s2527_s13), 1  ;;  %v2384_v19 = vld [vmem:[%s3040_s2 + $0x1a0] sm:$0xff]   ;;  %v2388_v23 = vld [vmem:[%s3040_s2 + $0x1a8] sm:$0xff]   ;;  %s3055_s11 = smov (!%p230_p7, %s227_s11), 4 }
  0x11   : > { %2173 = vmatpush3.bf16.msra.mxu1 %v2372_v7  ;;  %2152 = vmatprep.subr.bf16.mxu0 %v2373_v8  ;;  %s221_s6 = scalar_select %p220_p6, %s2523_s12, 4  ;;  %v2389_v24 = vld [vmem:[%s3040_s2 + $0x170] sm:$0xff]   ;;  %v2393_v28 = vld [vmem:[%s3040_s2 + $0x178] sm:$0xff]   ;;  %v2401_v38 = vld [vmem:[%s3040_s2 + $0x40] sm:$0xff]  }
  0x12   : > { %2174 = vmatprep.subr.bf16.mxu1 %v2374_v9  ;;  %s2324_s20 = smul.u32 20, %s3053_s13  ;;  %v2390_v25 = vld [vmem:[%s3040_s2 + $0x1f0] sm:$0xff]   ;;  %v2394_v29 = vld [vmem:[%s3040_s2 + $0x1f8] sm:$0xff]   ;;  %v2402_v39 = vld [vmem:[%s3040_s2 + $0xc0] sm:$0xff]   ;;  %s1814_s24 = sshll.u32 %s3055_s11, 2 }
  0x13   : > { %s1812_s23 = sshll.u32 %s221_s6, 2  ;;  %v2391_v26 = vld [vmem:[%s3040_s2 + $0x130] sm:$0xff]   ;;  %v2395_v30 = vld [vmem:[%s3040_s2 + $0x138] sm:$0xff]   ;;  %v2403_v50 = vld [vmem:[%s3040_s2] sm:$0xff]   ;;  %s3057_s12 = smov (!%p240_p8, %s2523_s12), 3 }
  0x14   : > { %2153 = vmatpush3.bf16.msra.mxu0 %v2375_v10  ;;  %s224_s30 = sadd.s32 %s2324_s20, %s1812_s23  ;;  %v2392_v27 = vld [vmem:[%s3040_s2 + $0x1b0] sm:$0xff]   ;;  %v2396_v31 = vld [vmem:[%s3040_s2 + $0x1b8] sm:$0xff]   ;;  %v2404_v51 = vld [vmem:[%s3040_s2 + $0x80] sm:$0xff]   ;;  %s234_s4 = sadd.s32 %s2324_s20, %s1814_s24 }
  0x15   : > { %2175 = vmatpush3.bf16.msra.mxu1 %v2376_v11  ;;  %2154 = vmatprep.subr.bf16.mxu0 %v2377_v12  ;;  %s1813_s10 = sshll.u32 %s224_s30, 2  ;;  %v2405_v56 = vld [vmem:[%s3040_s2 + $0x48] sm:$0xff]   ;;  %v2409_v62 = vld [vmem:[%s3040_s2 + $0x50] sm:$0xff]   ;;  %v2413_v2 = vld [vmem:[%s3040_s2 + $0x58] sm:$0xff]  }
  0x16   : > { %2176 = vmatprep.subr.bf16.mxu1 %v2378_v13  ;;  %s226_s27 = scalar_lea.vmem %s3038_s0, %s1813_s10  ;;  %v2406_v59 = vld [vmem:[%s3040_s2 + $0xc8] sm:$0xff]   ;;  %v2410_v63 = vld [vmem:[%s3040_s2 + $0xd0] sm:$0xff]   ;;  %v2414_v3 = vld [vmem:[%s3040_s2 + $0xd8] sm:$0xff]   ;;  %s1815_s10 = sshll.u32 %s234_s4, 2 }
  0x17   : > { %v247_v32 = vld [vmem:[%s226_s27] sm:$0x77]  ;;  %v248_v33 = vld [vmem:[%s226_s27 + $0x8] sm:$0x77]  ;;  %v2411_v0 = vld [vmem:[%s3040_s2 + $0x10] sm:$0xff]   ;;  %s236_s27 = scalar_lea.vmem %s3039_s1, %s1815_s10  ;;  %s1816_s10 = sshll.u32 %s3053_s13, 2 }
  0x18   : > { %2155 = vmatpush3.bf16.msra.mxu0 %v2379_v14  ;;  %v2703_v34 = vcombine.low %v247_v32, %v247_v32  ;;  %v1883_v35 = vcombine.high %v247_v32, %v247_v32  ;;  %v2705_v36 = vcombine.low %v248_v33, %v248_v33  ;;  %v1885_v37 = vcombine.high %v248_v33, %v248_v33  ;;  %v2407_v60 = vld [vmem:[%s3040_s2 + $0x8] sm:$0xff]   ;;  %v2412_v1 = vld [vmem:[%s3040_s2 + $0x90] sm:$0xff]   ;;  %v2415_v4 = vld [vmem:[%s3040_s2 + $0x18] sm:$0xff]   ;;  %s243_s19 = sadd.s32 %s1816_s10, %s3057_s12 }
  0x19   : > { %2177 = vmatpush3.bf16.msra.mxu1 %v2380_v15  ;;  %2156 = vmatprep.subr.bf16.mxu0 %v2381_v16  ;;  %v2408_v61 = vld [vmem:[%s3040_s2 + $0x88] sm:$0xff]   ;;  %v2416_v5 = vld [vmem:[%s3040_s2 + $0x98] sm:$0xff]   ;;  %v2417_v6 = vld [vmem:[%s3040_s2 + $0x60] sm:$0xff]   ;;  %s1817_s21 = sshll.u32 %s243_s19, 1 }
  0x1a   : > { %2178 = vmatprep.subr.bf16.mxu1 %v2382_v17  ;;  %v398_v40 = vshrl.u32 %v1883_v35, 16  ;;  %v400_v41 = vshll.u32 %v1883_v35, 16  ;;  %v412_v42 = vshrl.u32 %v1885_v37, 16  ;;  %v414_v43 = vshll.u32 %v1885_v37, 16  ;;  %v2418_v7 = vld [vmem:[%s3040_s2 + $0xe0] sm:$0xff]   ;;  %v2421_v10 = vld [vmem:[%s3040_s2 + $0x68] sm:$0xff]   ;;  %s245_s23 = scalar_lea.vmem %s3041_s3, %s1817_s21 }
  0x1b   : > { %v391_v44 = vshrl.u32 %v2703_v34, 16  ;;  %v393_v45 = vshll.u32 %v2703_v34, 16  ;;  %v405_v46 = vshrl.u32 %v2705_v36, 16  ;;  %v407_v47 = vshll.u32 %v2705_v36, 16  ;;  %v2419_v8 = vld [vmem:[%s3040_s2 + $0x20] sm:$0xff]   ;;  %v2422_v11 = vld [vmem:[%s3040_s2 + $0xe8] sm:$0xff]  }
  0x1c   : > { %2157 = vmatpush3.bf16.msra.mxu0 %v2383_v18  ;;  %v402_v48 = vrot.slane %v400_v41, 1  ;;  %v416_v49 = vrot.slane %v414_v43, 1  ;;  %v2420_v9 = vld [vmem:[%s3040_s2 + $0xa0] sm:$0xff]   ;;  %v2423_v12 = vld [vmem:[%s3040_s2 + $0x28] sm:$0xff]   ;;  %v2425_v14 = vld [vmem:[%s3040_s2 + $0x70] sm:$0xff]  }
  0x1d   : > { %2179 = vmatpush3.bf16.msra.mxu1 %v2384_v19  ;;  %2158 = vmatprep.subr.bf16.mxu0 %v2385_v20  ;;  %v395_v52 = vrot.slane %v393_v45, 1  ;;  %v409_v53 = vrot.slane %v407_v47, 1  ;;  %v2424_v13 = vld [vmem:[%s3040_s2 + $0xa8] sm:$0xff]   ;;  %v2426_v15 = vld [vmem:[%s3040_s2 + $0xf0] sm:$0xff]   ;;  %v2429_v18 = vld [vmem:[%s3040_s2 + $0x78] sm:$0xff]  }
  0x1e   : > { %2180 = vmatprep.subr.bf16.mxu1 %v2386_v21  ;;  %v403_v54 = vor.u32 %v402_v48, %v398_v40  ;;  %v417_v55 = vor.u32 %v416_v49, %v412_v42  ;;  %v2427_v16 = vld [vmem:[%s3040_s2 + $0x30] sm:$0xff]   ;;  %v2430_v19 = vld [vmem:[%s3040_s2 + $0xf8] sm:$0xff]   ;;  %v2451_v40 = vld [vmem:[%s3040_s2 + $0x220] sm:$0xff]  }
  0x1f   : > { %v396_v57 = vor.u32 %v395_v52, %v391_v44  ;;  %v410_v58 = vor.u32 %v409_v53, %v405_v46  ;;  %v2428_v17 = vld [vmem:[%s3040_s2 + $0xb0] sm:$0xff]   ;;  %v2431_v20 = vld [vmem:[%s3040_s2 + $0x38] sm:$0xff]   ;;  %v2452_v41 = vld [vmem:[%s3040_s2 + $0x2a0] sm:$0xff]  }
  0x20   : > { %2159 = vmatpush3.bf16.msra.mxu0 %v2387_v22  ;;  %646 = vmatprep.mubr.bf16.mxu0 %v403_v54  ;;  %v2432_v21 = vld [vmem:[%s3040_s2 + $0xb8] sm:$0xff]   ;;  %v2433_v22 = vld [vmem:[%s3040_s2 + $0x240] sm:$0xff]   ;;  %v2443_v32 = vld [vmem:[%s3040_s2 + $0x210] sm:$0xff]  }
  0x21   : > { %2181 = vmatpush3.bf16.msra.mxu1 %v2388_v23  ;;  %2160 = vmatprep.subr.bf16.mxu0 %v2389_v24  ;;  %v2434_v23 = vld [vmem:[%s3040_s2 + $0x2c0] sm:$0xff]   ;;  %v2444_v33 = vld [vmem:[%s3040_s2 + $0x290] sm:$0xff]   ;;  %v2453_v42 = vld [vmem:[%s3040_s2 + $0x268] sm:$0xff]  }
  0x22   : > { %2182 = vmatprep.subr.bf16.mxu1 %v2390_v25  ;;  %686 = vmatprep.mubr.bf16.mxu1 %v417_v55  ;;  %v2435_v24 = vld [vmem:[%s3040_s2 + $0x200] sm:$0xff]   ;;  %v2454_v43 = vld [vmem:[%s3040_s2 + $0x2e8] sm:$0xff]   ;;  %v2457_v46 = vld [vmem:[%s3040_s2 + $0x270] sm:$0xff]  }
  0x23   : > { %v2436_v25 = vld [vmem:[%s3040_s2 + $0x280] sm:$0xff]   ;;  %v2455_v44 = vld [vmem:[%s3040_s2 + $0x228] sm:$0xff]   ;;  %v2458_v47 = vld [vmem:[%s3040_s2 + $0x2f0] sm:$0xff]  }
  0x24   : > { %2161 = vmatpush3.bf16.msra.mxu0 %v2391_v26  ;;  %v2437_v26 = vld [vmem:[%s3040_s2 + $0x248] sm:$0xff]   ;;  %v2459_v48 = vld [vmem:[%s3040_s2 + $0x230] sm:$0xff]   ;;  %v2463_v52 = vld [vmem:[%s3040_s2 + $0x238] sm:$0xff]  }
  0x25   : > { %2183 = vmatpush3.bf16.msra.mxu1 %v2392_v27  ;;  %2162 = vmatprep.subr.bf16.mxu0 %v2393_v28  ;;  %v2438_v27 = vld [vmem:[%s3040_s2 + $0x2c8] sm:$0xff]   ;;  %v2460_v49 = vld [vmem:[%s3040_s2 + $0x2b0] sm:$0xff]   ;;  %v2464_v53 = vld [vmem:[%s3040_s2 + $0x2b8] sm:$0xff]  }
  0x26   : > { %2184 = vmatprep.subr.bf16.mxu1 %v2394_v29  ;;  %v2439_v28 = vld [vmem:[%s3040_s2 + $0x208] sm:$0xff]   ;;  %v249_v54 = vld [vmem:[%s236_s27] sm:$0x77] }
  0x27   : > { %v2440_v29 = vld [vmem:[%s3040_s2 + $0x288] sm:$0xff]  }
  0x28   : > { %2163 = vmatpush3.bf16.msra.mxu0 %v2395_v30  ;;  %v2441_v30 = vld [vmem:[%s3040_s2 + $0x250] sm:$0xff]   ;;  %v2456_v45 = vld [vmem:[%s3040_s2 + $0x2a8] sm:$0xff]  }
  0x29   : > { %2185 = vmatpush3.bf16.msra.mxu1 %v2396_v31  ;;  %2192 = vmatprep.subr.bf16.mxu0 %v2401_v38  ;;  %v2442_v31 = vld [vmem:[%s3040_s2 + $0x2d0] sm:$0xff]   ;;  %v2449_v38 = vld [vmem:[%s3040_s2 + $0x260] sm:$0xff]   ;;  %v250_v55 = vld [vmem:[%s236_s27 + $0x8] sm:$0x77] }
  0x2a   : > { %2214 = vmatprep.subr.bf16.mxu1 %v2402_v39  ;;  %v2450_v39 = vld [vmem:[%s3040_s2 + $0x2e0] sm:$0xff]  }
  0x2b   : > { %647 = vmatmul.mubr.bf16.vlgmr.msra.gmra.mrb[0].mxu0 %v396_v57  ;;  %v2469_v57 = vld [vmem:[%s3040_s2 + $0x340] sm:$0xff]  }
  0x2c   : > { %687 = vmatmul.mubr.bf16.vlgmr.msra.gmra.mrb[0].mxu1 %v410_v58  ;;  %2193 = vmatpush3.bf16.msra.mxu0 %v2403_v50  ;;  %v2461_v50 = vld [vmem:[%s3040_s2 + $0x278] sm:$0xff]   ;;  %v2017_v58 = vcombine.high %v250_v55, %v250_v55 }
  0x2d   : > { %2215 = vmatpush3.bf16.msra.mxu1 %v2404_v51  ;;  %2194 = vmatprep.subr.bf16.mxu0 %v2405_v56  ;;  %v2462_v51 = vld [vmem:[%s3040_s2 + $0x2f8] sm:$0xff]   ;;  %v2015_v56 = vcombine.high %v249_v54, %v249_v54 }
  0x2e   : > { %2216 = vmatprep.subr.bf16.mxu1 %v2406_v59  ;;  %922 = vmatprep.mubr.bf16.mxu0 %v1883_v35  ;;  %v2446_v35 = vld [vmem:[%s3040_s2 + $0x2d8] sm:$0xff]   ;;  %v2470_v59 = vld [vmem:[%s3040_s2 + $0x3c0] sm:$0xff]  }
  0x2f   : > { %962 = vmatprep.mubr.bf16.mxu1 %v1885_v37  ;;  %v2448_v37 = vld [vmem:[%s3040_s2 + $0x298] sm:$0xff]  }
  0x30   : > { %2195 = vmatpush3.bf16.msra.mxu0 %v2407_v60  ;;  %v2471_v60 = vld [vmem:[%s3040_s2 + $0x300] sm:$0xff]  }
  0x31   : > { %2217 = vmatpush3.bf16.msra.mxu1 %v2408_v61  ;;  %2196 = vmatprep.subr.bf16.mxu0 %v2409_v62  ;;  %v1395_v61 = vshrl.u32 %v2015_v56, 16  ;;  %v2920_v62 = vcombine.low %v249_v54, %v249_v54 }
  0x32   : > { %2218 = vmatprep.subr.bf16.mxu1 %v2410_v63  ;;  %v2922_v63 = vcombine.low %v250_v55, %v250_v55 }
  0x34   : > { %2197 = vmatpush3.bf16.msra.mxu0 %v2411_v0  ;;  %v2472_v0 = vld [vmem:[%s3040_s2 + $0x380] sm:$0xff]  }
  0x35   : > { %2219 = vmatpush3.bf16.msra.mxu1 %v2412_v1  ;;  %2198 = vmatprep.subr.bf16.mxu0 %v2413_v2  ;;  %v1397_v1 = vshll.u32 %v2015_v56, 16  ;;  %v2473_v2 = vld [vmem:[%s3040_s2 + $0x348] sm:$0xff]  }
  0x36   : > { %2220 = vmatprep.subr.bf16.mxu1 %v2414_v3  ;;  %v1409_v3 = vshrl.u32 %v2017_v58, 16 }
  0x38   : > { %2199 = vmatpush3.bf16.msra.mxu0 %v2415_v4  ;;  %v2474_v4 = vld [vmem:[%s3040_s2 + $0x3c8] sm:$0xff]  }
  0x39   : > { %2221 = vmatpush3.bf16.msra.mxu1 %v2416_v5  ;;  %2200 = vmatprep.subr.bf16.mxu0 %v2417_v6  ;;  %v1399_v5 = vrot.slane %v1397_v1, 1  ;;  %v2475_v6 = vld [vmem:[%s3040_s2 + $0x308] sm:$0xff]  }
  0x3a   : > { %2222 = vmatprep.subr.bf16.mxu1 %v2418_v7  ;;  %v1411_v7 = vshll.u32 %v2017_v58, 16 }
  0x3c   : > { %2201 = vmatpush3.bf16.msra.mxu0 %v2419_v8  ;;  %v2476_v8 = vld [vmem:[%s3040_s2 + $0x388] sm:$0xff]  }
  0x3d   : > { %2223 = vmatpush3.bf16.msra.mxu1 %v2420_v9  ;;  %2202 = vmatprep.subr.bf16.mxu0 %v2421_v10  ;;  %v1400_v9 = vor.u32 %v1399_v5, %v1395_v61  ;;  %v2477_v10 = vld [vmem:[%s3040_s2 + $0x350] sm:$0xff]  }
  0x3e   : > { %2224 = vmatprep.subr.bf16.mxu1 %v2422_v11  ;;  %v1413_v11 = vrot.slane %v1411_v7, 1 }
  0x40   : > { %2203 = vmatpush3.bf16.msra.mxu0 %v2423_v12  ;;  %v2478_v12 = vld [vmem:[%s3040_s2 + $0x3d0] sm:$0xff]  }
  0x41   : > { %2225 = vmatpush3.bf16.msra.mxu1 %v2424_v13  ;;  %2204 = vmatprep.subr.bf16.mxu0 %v2425_v14  ;;  %v2479_v13 = vld [vmem:[%s3040_s2 + $0x310] sm:$0xff]   ;;  %v1414_v14 = vor.u32 %v1413_v11, %v1409_v3 }
  0x42   : > { %2226 = vmatprep.subr.bf16.mxu1 %v2426_v15  ;;  %v2480_v15 = vld [vmem:[%s3040_s2 + $0x390] sm:$0xff]  }
  0x44   : > { %2205 = vmatpush3.bf16.msra.mxu0 %v2427_v16  ;;  %v2481_v16 = vld [vmem:[%s3040_s2 + $0x358] sm:$0xff]  }
  0x45   : > { %2227 = vmatpush3.bf16.msra.mxu1 %v2428_v17  ;;  %2206 = vmatprep.subr.bf16.mxu0 %v2429_v18  ;;  %v2482_v17 = vld [vmem:[%s3040_s2 + $0x3d8] sm:$0xff]  }
  0x46   : > { %2228 = vmatprep.subr.bf16.mxu1 %v2430_v19  ;;  %v2483_v18 = vld [vmem:[%s3040_s2 + $0x318] sm:$0xff]  }
  0x47   : > { %v2484_v19 = vld [vmem:[%s3040_s2 + $0x398] sm:$0xff]  }
  0x48   : > { %2207 = vmatpush3.bf16.msra.mxu0 %v2431_v20  ;;  %v2485_v20 = vld [vmem:[%s3040_s2 + $0x360] sm:$0xff]  }
  0x49   : > { %2229 = vmatpush3.bf16.msra.mxu1 %v2432_v21  ;;  %2236 = vmatprep.subr.bf16.mxu0 %v2433_v22  ;;  %v2486_v21 = vld [vmem:[%s3040_s2 + $0x3e0] sm:$0xff]  }
  0x4a   : > { %2258 = vmatprep.subr.bf16.mxu1 %v2434_v23  ;;  %v2487_v22 = vld [vmem:[%s3040_s2 + $0x320] sm:$0xff]  }
  0x4b   : > { %923 = vmatmul.mubr.bf16.vlgmr.msra.gmra.mrb[4].mxu0 %v2703_v34  ;;  %v2445_v34 = vld [vmem:[%s3040_s2 + $0x258] sm:$0xff]   ;;  %v2488_v23 = vld [vmem:[%s3040_s2 + $0x3a0] sm:$0xff]  }
  0x4c   : > { %963 = vmatmul.mubr.bf16.vlgmr.msra.gmra.mrb[4].mxu1 %v2705_v36  ;;  %2237 = vmatpush3.bf16.msra.mxu0 %v2435_v24  ;;  %v2447_v36 = vld [vmem:[%s3040_s2 + $0x218] sm:$0xff]   ;;  %v2489_v24 = vld [vmem:[%s3040_s2 + $0x368] sm:$0xff]  }
  0x4d   : > { %2259 = vmatpush3.bf16.msra.mxu1 %v2436_v25  ;;  %2238 = vmatprep.subr.bf16.mxu0 %v2437_v26  ;;  %v2490_v25 = vld [vmem:[%s3040_s2 + $0x3e8] sm:$0xff]  }
  0x4e   : > { %2260 = vmatprep.subr.bf16.mxu1 %v2438_v27  ;;  %1273 = vmatprep.mubr.bf16.mxu0 %v2015_v56  ;;  %v2491_v26 = vld [vmem:[%s3040_s2 + $0x328] sm:$0xff]  }
  0x4f   : > { %1313 = vmatprep.mubr.bf16.mxu1 %v2017_v58  ;;  %v2492_v27 = vld [vmem:[%s3040_s2 + $0x3a8] sm:$0xff]  }
  0x50   : > { %2239 = vmatpush3.bf16.msra.mxu0 %v2439_v28  ;;  %v2493_v28 = vld [vmem:[%s3040_s2 + $0x370] sm:$0xff]  }
  0x51   : > { %2261 = vmatpush3.bf16.msra.mxu1 %v2440_v29  ;;  %2240 = vmatprep.subr.bf16.mxu0 %v2441_v30  ;;  %v2494_v29 = vld [vmem:[%s3040_s2 + $0x3f0] sm:$0xff]  }
  0x52   : > { %2262 = vmatprep.subr.bf16.mxu1 %v2442_v31  ;;  %v2495_v30 = vld [vmem:[%s3040_s2 + $0x330] sm:$0xff]   ;;  %v1390_v31 = vshll.u32 %v2920_v62, 16 }
  0x54   : > { %2241 = vmatpush3.bf16.msra.mxu0 %v2443_v32  ;;  %v2496_v32 = vld [vmem:[%s3040_s2 + $0x3b0] sm:$0xff]  }
  0x55   : > { %2263 = vmatpush3.bf16.msra.mxu1 %v2444_v33  ;;  %2242 = vmatprep.subr.bf16.mxu0 %v2445_v34  ;;  %v1404_v33 = vshll.u32 %v2922_v63, 16  ;;  %v2497_v34 = vld [vmem:[%s3040_s2 + $0x378] sm:$0xff]  }
  0x56   : > { %2264 = vmatprep.subr.bf16.mxu1 %v2446_v35  ;;  %v2498_v35 = vld [vmem:[%s3040_s2 + $0x3f8] sm:$0xff]  }
  0x58   : > { %2243 = vmatpush3.bf16.msra.mxu0 %v2447_v36  ;;  %v1388_v36 = vshrl.u32 %v2920_v62, 16 }
  0x59   : > { %2265 = vmatpush3.bf16.msra.mxu1 %v2448_v37  ;;  %2244 = vmatprep.subr.bf16.mxu0 %v2449_v38  ;;  %v1402_v37 = vshrl.u32 %v2922_v63, 16  ;;  %v1392_v38 = vrot.slane %v1390_v31, 1 }
  0x5a   : > { %2266 = vmatprep.subr.bf16.mxu1 %v2450_v39  ;;  %v1406_v39 = vrot.slane %v1404_v33, 1 }
  0x5c   : > { %2245 = vmatpush3.bf16.msra.mxu0 %v2451_v40  ;;  %v2499_v40 = vld [vmem:[%s3040_s2 + $0x338] sm:$0xff]  }
  0x5d   : > { %2267 = vmatpush3.bf16.msra.mxu1 %v2452_v41  ;;  %2246 = vmatprep.subr.bf16.mxu0 %v2453_v42  ;;  %v2500_v41 = vld [vmem:[%s3040_s2 + $0x3b8] sm:$0xff]   ;;  %v1393_v42 = vor.u32 %v1392_v38, %v1388_v36 }
  0x5e   : > { %2268 = vmatprep.subr.bf16.mxu1 %v2454_v43  ;;  %v1407_v43 = vor.u32 %v1406_v39, %v1402_v37 }
  0x60   : > { %2247 = vmatpush3.bf16.msra.mxu0 %v2455_v44 }
  0x61   : > { %2269 = vmatpush3.bf16.msra.mxu1 %v2456_v45  ;;  %2248 = vmatprep.subr.bf16.mxu0 %v2457_v46 }
  0x62   : > { %2270 = vmatprep.subr.bf16.mxu1 %v2458_v47 }
  0x64   : > { %2249 = vmatpush3.bf16.msra.mxu0 %v2459_v48 }
  0x65   : > { %2271 = vmatpush3.bf16.msra.mxu1 %v2460_v49  ;;  %2250 = vmatprep.subr.bf16.mxu0 %v2461_v50 }
  0x66   : > { %2272 = vmatprep.subr.bf16.mxu1 %v2462_v51 }
  0x68   : > { %2251 = vmatpush3.bf16.msra.mxu0 %v2463_v52 }
  0x69   : > { %2273 = vmatpush3.bf16.msra.mxu1 %v2464_v53  ;;  %2280 = vmatprep.subr.bf16.mxu0 %v2469_v57 }
  0x6a   : > { %2302 = vmatprep.subr.bf16.mxu1 %v2470_v59 }
  0x6b   : > { %1274 = vmatmul.mubr.bf16.vlgmr.msra.gmra.mrb[8].mxu0 %v2920_v62 }
  0x6c   : > { %1314 = vmatmul.mubr.bf16.vlgmr.msra.gmra.mrb[8].mxu1 %v2922_v63  ;;  %2281 = vmatpush3.bf16.msra.mxu0 %v2471_v60 }
  0x6d   : > { %2303 = vmatpush3.bf16.msra.mxu1 %v2472_v0  ;;  %2282 = vmatprep.subr.bf16.mxu0 %v2473_v2 }
  0x6e   : > { %2304 = vmatprep.subr.bf16.mxu1 %v2474_v4  ;;  %1643 = vmatprep.mubr.bf16.mxu0 %v1400_v9 }
  0x6f   : > { %1683 = vmatprep.mubr.bf16.mxu1 %v1414_v14 }
  0x70   : > { %2283 = vmatpush3.bf16.msra.mxu0 %v2475_v6 }
  0x71   : > { %2305 = vmatpush3.bf16.msra.mxu1 %v2476_v8  ;;  %2284 = vmatprep.subr.bf16.mxu0 %v2477_v10 }
  0x72   : > { %2306 = vmatprep.subr.bf16.mxu1 %v2478_v12 }
  0x74   : > { %2285 = vmatpush3.bf16.msra.mxu0 %v2479_v13 }
  0x75   : > { %2307 = vmatpush3.bf16.msra.mxu1 %v2480_v15  ;;  %2286 = vmatprep.subr.bf16.mxu0 %v2481_v16 }
  0x76   : > { %2308 = vmatprep.subr.bf16.mxu1 %v2482_v17 }
  0x78   : > { %2287 = vmatpush3.bf16.msra.mxu0 %v2483_v18 }
  0x79   : > { %2309 = vmatpush3.bf16.msra.mxu1 %v2484_v19  ;;  %2288 = vmatprep.subr.bf16.mxu0 %v2485_v20 }
  0x7a   : > { %2310 = vmatprep.subr.bf16.mxu1 %v2486_v21 }
  0x7c   : > { %2289 = vmatpush3.bf16.msra.mxu0 %v2487_v22 }
  0x7d   : > { %2311 = vmatpush3.bf16.msra.mxu1 %v2488_v23  ;;  %2290 = vmatprep.subr.bf16.mxu0 %v2489_v24 }
  0x7e   : > { %2312 = vmatprep.subr.bf16.mxu1 %v2490_v25 }
  0x80   : > { %2291 = vmatpush3.bf16.msra.mxu0 %v2491_v26 }
  0x81   : > { %2313 = vmatpush3.bf16.msra.mxu1 %v2492_v27  ;;  %2292 = vmatprep.subr.bf16.mxu0 %v2493_v28 }
  0x82   : > { %2314 = vmatprep.subr.bf16.mxu1 %v2494_v29 }
  0x84   : > { %2293 = vmatpush3.bf16.msra.mxu0 %v2495_v30 }
  0x85   : > { %2315 = vmatpush3.bf16.msra.mxu1 %v2496_v32  ;;  %2294 = vmatprep.subr.bf16.mxu0 %v2497_v34 }
  0x86   : > { %2316 = vmatprep.subr.bf16.mxu1 %v2498_v35 }
  0x88   : > { %2295 = vmatpush3.bf16.msra.mxu0 %v2499_v40 }
  0x89   : > { %2317 = vmatpush3.bf16.msra.mxu1 %v2500_v41 }
  0x8b   : > { %1644 = vmatmul.mubr.bf16.vlgmr.msra.gmra.mrb[12].mxu0 %v1393_v42 }
  0x8c   : > { %1684 = vmatmul.mubr.bf16.vlgmr.msra.gmra.mrb[12].mxu1 %v1407_v43 }
  0xfe   : > { %v2164_v44 = vpop.f32.mrb[0].mxu0 }
  0xff   : > { %v2186_v45 = vpop.f32.mrb[0].mxu1  ;;  %v2165_v46 = vpop.f32.mrb[1].mxu0 }
 0x100   : > { %v2187_v47 = vpop.f32.mrb[1].mxu1  ;;  %v2166_v48 = vadd.f32 %v2165_v46, %v2164_v44  ;;  %v2167_v50 = vpop.f32.mrb[2].mxu0 }
 0x101   : > { %v2188_v49 = vadd.f32 %v2187_v47, %v2186_v45  ;;  %v2189_v51 = vpop.f32.mrb[2].mxu1  ;;  %v2168_v52 = vpop.f32.mrb[3].mxu0 }
 0x102   : > { %v2190_v53 = vpop.f32.mrb[3].mxu1 }
 0x103   : > { %v689_v54 = vadd.f32 %v2188_v49, %v2166_v48 }
 0x11e   : > { %v2208_v55 = vpop.f32.mrb[4].mxu0 }
 0x11f   : > { %v2230_v56 = vpop.f32.mrb[4].mxu1  ;;  %v2209_v57 = vpop.f32.mrb[5].mxu0 }
 0x120   : > { %v2231_v58 = vpop.f32.mrb[5].mxu1  ;;  %v2210_v59 = vadd.f32 %v2209_v57, %v2208_v55  ;;  %v2211_v61 = vpop.f32.mrb[6].mxu0 }
 0x121   : > { %v2232_v60 = vadd.f32 %v2231_v58, %v2230_v56  ;;  %v2233_v62 = vpop.f32.mrb[6].mxu1  ;;  %v2212_v63 = vpop.f32.mrb[7].mxu0 }
 0x122   : > { %v2234_v0 = vpop.f32.mrb[7].mxu1  ;;  %v925_v1 = vadd.f32 %v2210_v59, %v689_v54 }
 0x124   : > { %v965_v2 = vadd.f32 %v2232_v60, %v925_v1 }
 0x13e   : > { %v2252_v3 = vpop.f32.mrb[8].mxu0 }
 0x13f   : > { %v2274_v4 = vpop.f32.mrb[8].mxu1  ;;  %v2253_v5 = vpop.f32.mrb[9].mxu0 }
 0x140   : > { %v2275_v6 = vpop.f32.mrb[9].mxu1  ;;  %v2254_v7 = vadd.f32 %v2253_v5, %v2252_v3  ;;  %v2255_v9 = vpop.f32.mrb[10].mxu0 }
 0x141   : > { %v2276_v8 = vadd.f32 %v2275_v6, %v2274_v4  ;;  %v2277_v10 = vpop.f32.mrb[10].mxu1  ;;  %v2256_v11 = vpop.f32.mrb[11].mxu0 }
 0x142   : > { %v2278_v12 = vpop.f32.mrb[11].mxu1 }
 0x143   : > { %v1316_v13 = vadd.f32 %v2276_v8, %v2254_v7 }
 0x145   : > { %v1321_v14 = vadd.f32 %v1316_v13, %v965_v2 }
 0x15e   : > { %v2296_v15 = vpop.f32.mrb[12].mxu0 }
 0x15f   : > { %v2318_v16 = vpop.f32.mrb[12].mxu1  ;;  %v2297_v17 = vpop.f32.mrb[13].mxu0 }
 0x160   : > { %v2319_v18 = vpop.f32.mrb[13].mxu1  ;;  %v2298_v19 = vadd.f32 %v2297_v17, %v2296_v15  ;;  %v2299_v21 = vpop.f32.mrb[14].mxu0 }
 0x161   : > { %v2320_v20 = vadd.f32 %v2319_v18, %v2318_v16  ;;  %v2321_v22 = vpop.f32.mrb[14].mxu1  ;;  %v2300_v23 = vpop.f32.mrb[15].mxu0 }
 0x162   : > { %v2322_v24 = vpop.f32.mrb[15].mxu1 }
 0x163   : > { %v1686_v25 = vadd.f32 %v2320_v20, %v2298_v19 }
 0x165   : > { %v1691_v26 = vadd.f32 %v1686_v25, %v1321_v14 }
 0x167   : > { %vm1692_vm0 = vcmp.ge.f32.partialorder %v1691_v26, 0.0  ;;  %v1693_v27 = vmul.f32 0.2, %v1691_v26 }
 0x169   : > { %v1694_v28 = vsel %vm1692_vm0, %v1691_v26, %v1693_v27 }
 0x16a   : > { %v1695_v29 = vpack.c.bf16 %v1694_v28, %v1694_v28 }
 0x16c   : > { %1696 = vst [vmem:[%s245_s23] sm:$0x3] %v1695_v29 }
 0x16d PF: > { %s13_s16 = sadd.s32 1, %s2539_s16   ;;  %s3042_s12 = smov %s2531_s14 }
 0x16e   : > { %p10_p9 = scmp.ge.s32.totalorder %s13_s16, 10   ;;  %s3043_s13 = smov %s2535_s15 }
 0x16f   : > { %s3044_s14 = smov %s3047_s17  ;;  %s3045_s15 = smov %s3051_s18 }
 0x170   :  { %12 = sbr.rel (!%p10_p9) target bundleno = 3 (0x3), region = 68 }

// kernel: discriminator_linear_forward.6
= control target key start
LH: loop header
LB: loop body
LE: loop exit
PB: predicated region body
PF: predicated region fallthrough
CT: control target
= control target key end

     0   :  { %s2554_s12 = smov 0   ;;  %s2556_s13 = smov 0   ;;  %s3045_s0 = inlined_call_operand.vmem [shape: bf16[2,3,3,512], index: 0, kind: input, shape index: {}, may-alias: {0,1}]   ;;  %s3046_s1 = inlined_call_operand.vmem [shape: bf16[2,3,3,512], index: 1, kind: input, shape index: {}, may-alias: {0,1}]   ;;  %s3047_s2 = inlined_call_operand.vmem [shape: bf16[4,512,128], index: 2, kind: input, shape index: {}]   ;;  %s3048_s3 = inlined_call_operand.vmem [shape: bf16[2,2,2,128], index: 3, kind: output, shape index: {}]  }
   0x1   :  { %s2558_s14 = smov 0   ;;  %s2560_s15 = smov 0  }
   0x2   :  { %s2562_s16 = smov 0  }
   0x3 LB: > { %s22_s17 = sadd.s32 1, %s2523_s14  ;;  %s25_s18 = sadd.s32 1, %s2527_s15  ;;  %s2531_s16 = sphi %s2562_s16, %s13_s16   ;;  %s2527_s15 = sphi %s2560_s15, %s3052_s15   ;;  %s2523_s14 = sphi %s2558_s14, %s3051_s14   ;;  %s2519_s13 = sphi %s2556_s13, %s3050_s13   ;;  %s2515_s12 = sphi %s2554_s12, %s3049_s12  }
   0x4   : > { %p23_p0 = scmp.ge.s32.totalorder %s22_s17, 2  ;;  %p1817_p1 = scmp.ge.s32.totalorder %s2531_s16, 1 }
   0x5   : > { %p177_p2 = scmp.lt.s32.totalorder %s2531_s16, 5 }
   0x6   : > { %s3054_s17 = smov (%p23_p0, %s22_s17), 0  ;;  %s3056_s18 = smov (!%p23_p0, %s25_s18), %s2527_s15 }
   0x7   : > { %p178_p3 = pnand %p1817_p1, %p177_p2  ;;  %p27_p4 = scmp.ge.s32.totalorder %s3056_s18, 2 }
   0x8   : > { %v2363_v0 = vld [vmem:[%s3047_s2 + $0x140] sm:$0xff] (!%p178_p3)   ;;  %v2367_v4 = vld [vmem:[%s3047_s2 + $0x148] sm:$0xff] (!%p178_p3)   ;;  %v2371_v8 = vld [vmem:[%s3047_s2 + $0x150] sm:$0xff] (!%p178_p3)   ;;  %p217_p5 = scmp.lt.s32.totalorder (!%p178_p3), %s2519_s13, 1  ;;  %p219_p6 = scmp.lt.s32.totalorder (!%p178_p3), %s2515_s12, 2  ;;  %v381_v28 = vlaneseq (!%p178_p3) }
   0x9   : > { %s3058_s18 = smov (%p27_p4, %s3056_s18), 0  ;;  %181 = sbr.rel (%p178_p3) target bundleno = 365 (0x16d), region = 32 }
   0xa   : > { %v2364_v1 = vld [vmem:[%s3047_s2 + $0x1c0] sm:$0xff] (!%p178_p3)   ;;  %2145 = vmatprep.subr.bf16.mxu0 (!%p178_p3), %v2363_v0  ;;  %v2368_v5 = vld [vmem:[%s3047_s2 + $0x1c8] sm:$0xff] (!%p178_p3)   ;;  %v2372_v9 = vld [vmem:[%s3047_s2 + $0x1d0] sm:$0xff] (!%p178_p3)   ;;  %v382_v33 = vshrl.u32 (!%p178_p3), %v381_v28, 7  ;;  %v2533_v36 = vmov (!%p178_p3), 1983009808  }
   0xb   : > { %v2365_v2 = vld [vmem:[%s3047_s2 + $0x100] sm:$0xff] (!%p178_p3)   ;;  %2167 = vmatprep.subr.bf16.mxu1 (!%p178_p3), %v2364_v1  ;;  %v2369_v6 = vld [vmem:[%s3047_s2 + $0x108] sm:$0xff] (!%p178_p3)   ;;  %v2373_v10 = vld [vmem:[%s3047_s2 + $0x110] sm:$0xff] (!%p178_p3)   ;;  %v379_v37 = vunpack.c.l.s4 (!%p178_p3), %v2533_v36  ;;  %s226_s19 = sadd.s32 (!%p178_p3), 1, %s2515_s12  ;;  %p239_p8 = scmp.lt.s32.totalorder (!%p178_p3), %s2515_s12, 1 }
   0xc   : > { %v2366_v3 = vld [vmem:[%s3047_s2 + $0x180] sm:$0xff] (!%p178_p3)   ;;  %2146 = vmatpush3.bf16.msra.mxu0 (!%p178_p3), %v2365_v2  ;;  %v2370_v7 = vld [vmem:[%s3047_s2 + $0x188] sm:$0xff] (!%p178_p3)   ;;  %v2374_v11 = vld [vmem:[%s3047_s2 + $0x190] sm:$0xff] (!%p178_p3)   ;;  %p229_p7 = scmp.lt.s32.totalorder (!%p178_p3), %s226_s19, 2 }
   0xd   : > { %2168 = vmatpush3.bf16.msra.mxu1 (!%p178_p3), %v2366_v3  ;;  %2147 = vmatprep.subr.bf16.mxu0 (!%p178_p3), %v2367_v4  ;;  %v2375_v12 = vld [vmem:[%s3047_s2 + $0x158] sm:$0xff] (!%p178_p3)   ;;  %v2379_v16 = vld [vmem:[%s3047_s2 + $0x160] sm:$0xff] (!%p178_p3)   ;;  %v2383_v20 = vld [vmem:[%s3047_s2 + $0x168] sm:$0xff] (!%p178_p3)   ;;  %v380_v39 = vunpack.c.0.s8 (!%p178_p3), %v379_v37 }
   0xe   : > { %2169 = vmatprep.subr.bf16.mxu1 (!%p178_p3), %v2368_v5  ;;  %v2376_v13 = vld [vmem:[%s3047_s2 + $0x1d8] sm:$0xff] (!%p178_p3)   ;;  %v2380_v17 = vld [vmem:[%s3047_s2 + $0x1e0] sm:$0xff] (!%p178_p3)   ;;  %v2384_v21 = vld [vmem:[%s3047_s2 + $0x1e8] sm:$0xff] (!%p178_p3)  }
   0xf   : > { %v2377_v14 = vld [vmem:[%s3047_s2 + $0x118] sm:$0xff] (!%p178_p3)   ;;  %v2381_v18 = vld [vmem:[%s3047_s2 + $0x120] sm:$0xff] (!%p178_p3)   ;;  %v2385_v22 = vld [vmem:[%s3047_s2 + $0x128] sm:$0xff] (!%p178_p3)   ;;  %v2702_v41 = vsub.s32 (!%p178_p3), %v380_v39, %v382_v33 }
  0x10   : > { %2148 = vmatpush3.bf16.msra.mxu0 %v2369_v6  ;;  %v2378_v15 = vld [vmem:[%s3047_s2 + $0x198] sm:$0xff]   ;;  %s3060_s13 = smov (!%p217_p5, %s2519_s13), 1  ;;  %v2382_v19 = vld [vmem:[%s3047_s2 + $0x1a0] sm:$0xff]   ;;  %v2386_v23 = vld [vmem:[%s3047_s2 + $0x1a8] sm:$0xff]   ;;  %s3062_s19 = smov (!%p229_p7, %s226_s19), 2 }
  0x11   : > { %2170 = vmatpush3.bf16.msra.mxu1 %v2370_v7  ;;  %2149 = vmatprep.subr.bf16.mxu0 %v2371_v8  ;;  %s220_s6 = scalar_select %p219_p6, %s2515_s12, 2  ;;  %v2387_v24 = vld [vmem:[%s3047_s2 + $0x170] sm:$0xff]   ;;  %v2391_v29 = vld [vmem:[%s3047_s2 + $0x178] sm:$0xff]   ;;  %v2396_v35 = vld [vmem:[%s3047_s2 + $0x40] sm:$0xff]  }
  0x12   : > { %2171 = vmatprep.subr.bf16.mxu1 %v2372_v9  ;;  %s2321_s20 = smul.u32 12, %s3060_s13  ;;  %v2388_v25 = vld [vmem:[%s3047_s2 + $0x1f0] sm:$0xff]   ;;  %v2392_v30 = vld [vmem:[%s3047_s2 + $0x1f8] sm:$0xff]   ;;  %v2397_v38 = vld [vmem:[%s3047_s2 + $0xc0] sm:$0xff]   ;;  %s1820_s25 = sshll.u32 %s3062_s19, 2 }
  0x13   : > { %s1818_s23 = sshll.u32 %s220_s6, 2  ;;  %v2389_v26 = vld [vmem:[%s3047_s2 + $0x130] sm:$0xff]   ;;  %v2393_v31 = vld [vmem:[%s3047_s2 + $0x138] sm:$0xff]   ;;  %v2398_v58 = vld [vmem:[%s3047_s2] sm:$0xff]   ;;  %s3064_s12 = smov (!%p239_p8, %s2515_s12), 1 }
  0x14   : > { %2150 = vmatpush3.bf16.msra.mxu0 %v2373_v10  ;;  %s223_s30 = sadd.s32 %s2321_s20, %s1818_s23  ;;  %v2390_v27 = vld [vmem:[%s3047_s2 + $0x1b0] sm:$0xff]   ;;  %v2394_v32 = vld [vmem:[%s3047_s2 + $0x1b8] sm:$0xff]   ;;  %v2399_v61 = vld [vmem:[%s3047_s2 + $0x80] sm:$0xff]   ;;  %s233_s5 = sadd.s32 %s2321_s20, %s1820_s25 }
  0x15   : > { %2172 = vmatpush3.bf16.msra.mxu1 %v2374_v11  ;;  %2151 = vmatprep.subr.bf16.mxu0 %v2375_v12  ;;  %s1819_s10 = sshll.u32 %s223_s30, 1  ;;  %v2400_v0 = vld [vmem:[%s3047_s2 + $0x48] sm:$0xff]   ;;  %v2404_v4 = vld [vmem:[%s3047_s2 + $0x50] sm:$0xff]   ;;  %v2408_v8 = vld [vmem:[%s3047_s2 + $0x58] sm:$0xff]   ;;  %s1821_s11 = sshll.u32 %s233_s5, 1 }
  0x16   : > { %2173 = vmatprep.subr.bf16.mxu1 %v2376_v13  ;;  %s225_s27 = scalar_lea.vmem %s3045_s0, %s1819_s10  ;;  %v2401_v1 = vld [vmem:[%s3047_s2 + $0xc8] sm:$0xff]   ;;  %v2405_v5 = vld [vmem:[%s3047_s2 + $0xd0] sm:$0xff]   ;;  %v2409_v9 = vld [vmem:[%s3047_s2 + $0xd8] sm:$0xff]   ;;  %s235_s28 = scalar_lea.vmem %s3046_s1, %s1821_s11 }
  0x17   : > { %v245_v34 = vld [vmem:[%s225_s27] sm:$0xff]  ;;  %v2402_v2 = vld [vmem:[%s3047_s2 + $0x8] sm:$0xff]   ;;  %v2406_v6 = vld [vmem:[%s3047_s2 + $0x10] sm:$0xff]   ;;  %s1822_s9 = sshll.u32 %s3060_s13, 1 }
  0x18   : > { %2152 = vmatpush3.bf16.msra.mxu0 %v2377_v14  ;;  %v377_v40 = vcombine.high %v245_v34, %v245_v34  ;;  %v2705_v42 = vrot.slane %v245_v34, %v2702_v41  ;;  %v2403_v3 = vld [vmem:[%s3047_s2 + $0x88] sm:$0xff]   ;;  %v2407_v7 = vld [vmem:[%s3047_s2 + $0x90] sm:$0xff]   ;;  %v2410_v10 = vld [vmem:[%s3047_s2 + $0x18] sm:$0xff]   ;;  %s242_s10 = sadd.s32 %s1822_s9, %s3064_s12 }
  0x19   : > { %2174 = vmatpush3.bf16.msra.mxu1 %v2378_v15  ;;  %2153 = vmatprep.subr.bf16.mxu0 %v2379_v16  ;;  %v2411_v11 = vld [vmem:[%s3047_s2 + $0x98] sm:$0xff]   ;;  %v2412_v12 = vld [vmem:[%s3047_s2 + $0x60] sm:$0xff]   ;;  %v2416_v16 = vld [vmem:[%s3047_s2 + $0x68] sm:$0xff]   ;;  %s243_s22 = scalar_lea.vmem %s3048_s3, %s242_s10 }
  0x1a   : > { %2175 = vmatprep.subr.bf16.mxu1 %v2380_v17  ;;  %v2708_v43 = vrot.slane %v377_v40, %v2702_v41  ;;  %v392_v44 = vcombine.high %v2705_v42, %v2705_v42  ;;  %v395_v46 = vshrl.u32 %v2705_v42, 16  ;;  %v397_v47 = vshll.u32 %v2705_v42, 16  ;;  %v2413_v13 = vld [vmem:[%s3047_s2 + $0xe0] sm:$0xff]   ;;  %v2417_v17 = vld [vmem:[%s3047_s2 + $0xe8] sm:$0xff]   ;;  %v2436_v36 = vld [vmem:[%s3047_s2 + $0x250] sm:$0xff]  }
  0x1b   : > { %v2414_v14 = vld [vmem:[%s3047_s2 + $0x20] sm:$0xff]   ;;  %v2433_v33 = vld [vmem:[%s3047_s2 + $0x2c8] sm:$0xff]   ;;  %v2437_v37 = vld [vmem:[%s3047_s2 + $0x2d0] sm:$0xff]  }
  0x1c   : > { %2154 = vmatpush3.bf16.msra.mxu0 %v2381_v18  ;;  %v393_v45 = vcombine.high %v2708_v43, %v2708_v43  ;;  %v409_v48 = vshrl.u32 %v2708_v43, 16  ;;  %v411_v49 = vshll.u32 %v2708_v43, 16  ;;  %v402_v50 = vshrl.u32 %v392_v44, 16  ;;  %v2415_v15 = vld [vmem:[%s3047_s2 + $0xa0] sm:$0xff]   ;;  %v2418_v18 = vld [vmem:[%s3047_s2 + $0x28] sm:$0xff]   ;;  %v2439_v39 = vld [vmem:[%s3047_s2 + $0x290] sm:$0xff]  }
  0x1d   : > { %2176 = vmatpush3.bf16.msra.mxu1 %v2382_v19  ;;  %2155 = vmatprep.subr.bf16.mxu0 %v2383_v20  ;;  %v404_v51 = vshll.u32 %v392_v44, 16  ;;  %v399_v54 = vrot.slane %v397_v47, 1  ;;  %v2419_v19 = vld [vmem:[%s3047_s2 + $0xa8] sm:$0xff]   ;;  %v2420_v20 = vld [vmem:[%s3047_s2 + $0x70] sm:$0xff]   ;;  %v2428_v28 = vld [vmem:[%s3047_s2 + $0x240] sm:$0xff]  }
  0x1e   : > { %2177 = vmatprep.subr.bf16.mxu1 %v2384_v21  ;;  %v416_v52 = vshrl.u32 %v393_v45, 16  ;;  %v418_v53 = vshll.u32 %v393_v45, 16  ;;  %v413_v55 = vrot.slane %v411_v49, 1  ;;  %v2421_v21 = vld [vmem:[%s3047_s2 + $0xf0] sm:$0xff]   ;;  %v2434_v34 = vld [vmem:[%s3047_s2 + $0x208] sm:$0xff]   ;;  %v2440_v40 = vld [vmem:[%s3047_s2 + $0x258] sm:$0xff]  }
  0x1f   : > { %v406_v56 = vrot.slane %v404_v51, 1  ;;  %v400_v59 = vor.u32 %v399_v54, %v395_v46  ;;  %v2445_v46 = vld [vmem:[%s3047_s2 + $0x2e0] sm:$0xff]   ;;  %v2448_v49 = vld [vmem:[%s3047_s2 + $0x268] sm:$0xff]  }
  0x20   : > { %2156 = vmatpush3.bf16.msra.mxu0 %v2385_v22  ;;  %v420_v57 = vrot.slane %v418_v53, 1  ;;  %v414_v60 = vor.u32 %v413_v55, %v409_v48  ;;  %v2422_v22 = vld [vmem:[%s3047_s2 + $0x30] sm:$0xff]   ;;  %v2446_v47 = vld [vmem:[%s3047_s2 + $0x220] sm:$0xff]   ;;  %v2450_v51 = vld [vmem:[%s3047_s2 + $0x228] sm:$0xff]  }
  0x21   : > { %2178 = vmatpush3.bf16.msra.mxu1 %v2386_v23  ;;  %2157 = vmatprep.subr.bf16.mxu0 %v2387_v24  ;;  %v407_v62 = vor.u32 %v406_v56, %v402_v50  ;;  %v2423_v23 = vld [vmem:[%s3047_s2 + $0xb0] sm:$0xff]   ;;  %v2424_v24 = vld [vmem:[%s3047_s2 + $0x78] sm:$0xff]   ;;  %v2447_v48 = vld [vmem:[%s3047_s2 + $0x2a0] sm:$0xff]  }
  0x22   : > { %2179 = vmatprep.subr.bf16.mxu1 %v2388_v25  ;;  %v421_v63 = vor.u32 %v420_v57, %v416_v52  ;;  %v2425_v25 = vld [vmem:[%s3047_s2 + $0xf8] sm:$0xff]   ;;  %v2449_v50 = vld [vmem:[%s3047_s2 + $0x2e8] sm:$0xff]   ;;  %v246_v52 = vld [vmem:[%s235_s28] sm:$0xff] }
  0x23   : > { %650 = vmatprep.mubr.bf16.mxu0 %v407_v62  ;;  %v2451_v53 = vld [vmem:[%s3047_s2 + $0x2a8] sm:$0xff]   ;;  %v2889_v54 = vrot.slane %v246_v52, %v2702_v41  ;;  %v1040_v55 = vcombine.high %v246_v52, %v246_v52  ;;  %v2452_v56 = vld [vmem:[%s3047_s2 + $0x270] sm:$0xff]  }
  0x24   : > { %2158 = vmatpush3.bf16.msra.mxu0 %v2389_v26  ;;  %690 = vmatprep.mubr.bf16.mxu1 %v421_v63  ;;  %v2426_v26 = vld [vmem:[%s3047_s2 + $0x38] sm:$0xff]   ;;  %v2453_v57 = vld [vmem:[%s3047_s2 + $0x2f0] sm:$0xff]  }
  0x25   : > { %2180 = vmatpush3.bf16.msra.mxu1 %v2390_v27  ;;  %2159 = vmatprep.subr.bf16.mxu0 %v2391_v29  ;;  %v2427_v27 = vld [vmem:[%s3047_s2 + $0xb8] sm:$0xff]   ;;  %v2429_v29 = vld [vmem:[%s3047_s2 + $0x2c0] sm:$0xff]  }
  0x26   : > { %2181 = vmatprep.subr.bf16.mxu1 %v2392_v30  ;;  %v2430_v30 = vld [vmem:[%s3047_s2 + $0x200] sm:$0xff]   ;;  %v2456_v63 = vld [vmem:[%s3047_s2 + $0x278] sm:$0xff]  }
  0x28   : > { %2160 = vmatpush3.bf16.msra.mxu0 %v2393_v31  ;;  %v2431_v31 = vld [vmem:[%s3047_s2 + $0x280] sm:$0xff]  }
  0x29   : > { %2182 = vmatpush3.bf16.msra.mxu1 %v2394_v32  ;;  %2189 = vmatprep.subr.bf16.mxu0 %v2396_v35  ;;  %v2432_v32 = vld [vmem:[%s3047_s2 + $0x248] sm:$0xff]  }
  0x2a   : > { %2211 = vmatprep.subr.bf16.mxu1 %v2397_v38  ;;  %v2435_v35 = vld [vmem:[%s3047_s2 + $0x288] sm:$0xff]   ;;  %v2438_v38 = vld [vmem:[%s3047_s2 + $0x210] sm:$0xff]  }
  0x2b   : > { %651 = vmatmul.mubr.bf16.vlgmr.msra.gmra.mrb[0].mxu0 %v400_v59  ;;  %v2900_v59 = vrot.slane %v1040_v55, %v2702_v41  ;;  %v2457_v41 = vld [vmem:[%s3047_s2 + $0x2f8] sm:$0xff]  }
  0x2c   : > { %691 = vmatmul.mubr.bf16.vlgmr.msra.gmra.mrb[0].mxu1 %v414_v60  ;;  %2190 = vmatpush3.bf16.msra.mxu0 %v2398_v58  ;;  %v1055_v58 = vcombine.high %v2889_v54, %v2889_v54  ;;  %v2454_v60 = vld [vmem:[%s3047_s2 + $0x230] sm:$0xff]  }
  0x2d   : > { %2212 = vmatpush3.bf16.msra.mxu1 %v2399_v61  ;;  %2191 = vmatprep.subr.bf16.mxu0 %v2400_v0  ;;  %v2455_v61 = vld [vmem:[%s3047_s2 + $0x2b0] sm:$0xff]   ;;  %v1056_v62 = vcombine.high %v2900_v59, %v2900_v59  ;;  %v2458_v0 = vld [vmem:[%s3047_s2 + $0x238] sm:$0xff]  }
  0x2e   : > { %2213 = vmatprep.subr.bf16.mxu1 %v2401_v1  ;;  %926 = vmatprep.mubr.bf16.mxu0 %v392_v44  ;;  %v2443_v44 = vld [vmem:[%s3047_s2 + $0x298] sm:$0xff]  }
  0x2f   : > { %966 = vmatprep.mubr.bf16.mxu1 %v393_v45  ;;  %v2444_v45 = vld [vmem:[%s3047_s2 + $0x260] sm:$0xff]   ;;  %v2459_v1 = vld [vmem:[%s3047_s2 + $0x2b8] sm:$0xff]  }
  0x30   : > { %2192 = vmatpush3.bf16.msra.mxu0 %v2402_v2  ;;  %v1409_v2 = vshll.u32 %v1055_v58, 16 }
  0x31   : > { %2214 = vmatpush3.bf16.msra.mxu1 %v2403_v3  ;;  %2193 = vmatprep.subr.bf16.mxu0 %v2404_v4  ;;  %v2461_v3 = vld [vmem:[%s3047_s2 + $0x340] sm:$0xff]   ;;  %v1423_v4 = vshll.u32 %v1056_v62, 16 }
  0x32   : > { %2215 = vmatprep.subr.bf16.mxu1 %v2405_v5  ;;  %v2462_v5 = vld [vmem:[%s3047_s2 + $0x3c0] sm:$0xff]  }
  0x34   : > { %2194 = vmatpush3.bf16.msra.mxu0 %v2406_v6  ;;  %v1407_v6 = vshrl.u32 %v1055_v58, 16 }
  0x35   : > { %2216 = vmatpush3.bf16.msra.mxu1 %v2407_v7  ;;  %2195 = vmatprep.subr.bf16.mxu0 %v2408_v8  ;;  %v1421_v7 = vshrl.u32 %v1056_v62, 16  ;;  %v2463_v8 = vld [vmem:[%s3047_s2 + $0x300] sm:$0xff]  }
  0x36   : > { %2217 = vmatprep.subr.bf16.mxu1 %v2409_v9  ;;  %v1411_v9 = vrot.slane %v1409_v2, 1 }
  0x38   : > { %2196 = vmatpush3.bf16.msra.mxu0 %v2410_v10  ;;  %v1425_v10 = vrot.slane %v1423_v4, 1 }
  0x39   : > { %2218 = vmatpush3.bf16.msra.mxu1 %v2411_v11  ;;  %2197 = vmatprep.subr.bf16.mxu0 %v2412_v12  ;;  %v2464_v11 = vld [vmem:[%s3047_s2 + $0x380] sm:$0xff]   ;;  %v2465_v12 = vld [vmem:[%s3047_s2 + $0x348] sm:$0xff]  }
  0x3a   : > { %2219 = vmatprep.subr.bf16.mxu1 %v2413_v13  ;;  %v2466_v13 = vld [vmem:[%s3047_s2 + $0x3c8] sm:$0xff]  }
  0x3c   : > { %2198 = vmatpush3.bf16.msra.mxu0 %v2414_v14  ;;  %v2467_v14 = vld [vmem:[%s3047_s2 + $0x308] sm:$0xff]  }
  0x3d   : > { %2220 = vmatpush3.bf16.msra.mxu1 %v2415_v15  ;;  %2199 = vmatprep.subr.bf16.mxu0 %v2416_v16  ;;  %v1412_v15 = vor.u32 %v1411_v9, %v1407_v6  ;;  %v1426_v16 = vor.u32 %v1425_v10, %v1421_v7 }
  0x3e   : > { %2221 = vmatprep.subr.bf16.mxu1 %v2417_v17  ;;  %v2468_v17 = vld [vmem:[%s3047_s2 + $0x388] sm:$0xff]  }
  0x40   : > { %2200 = vmatpush3.bf16.msra.mxu0 %v2418_v18  ;;  %v2469_v18 = vld [vmem:[%s3047_s2 + $0x350] sm:$0xff]  }
  0x41   : > { %2222 = vmatpush3.bf16.msra.mxu1 %v2419_v19  ;;  %2201 = vmatprep.subr.bf16.mxu0 %v2420_v20  ;;  %v2470_v19 = vld [vmem:[%s3047_s2 + $0x3d0] sm:$0xff]  }
  0x42   : > { %2223 = vmatprep.subr.bf16.mxu1 %v2421_v21  ;;  %v2471_v20 = vld [vmem:[%s3047_s2 + $0x310] sm:$0xff]  }
  0x43   : > { %v2472_v21 = vld [vmem:[%s3047_s2 + $0x390] sm:$0xff]  }
  0x44   : > { %2202 = vmatpush3.bf16.msra.mxu0 %v2422_v22  ;;  %v2473_v22 = vld [vmem:[%s3047_s2 + $0x358] sm:$0xff]  }
  0x45   : > { %2224 = vmatpush3.bf16.msra.mxu1 %v2423_v23  ;;  %2203 = vmatprep.subr.bf16.mxu0 %v2424_v24  ;;  %v2474_v23 = vld [vmem:[%s3047_s2 + $0x3d8] sm:$0xff]  }
  0x46   : > { %2225 = vmatprep.subr.bf16.mxu1 %v2425_v25  ;;  %v2475_v24 = vld [vmem:[%s3047_s2 + $0x318] sm:$0xff]  }
  0x47   : > { %v2476_v25 = vld [vmem:[%s3047_s2 + $0x398] sm:$0xff]  }
  0x48   : > { %2204 = vmatpush3.bf16.msra.mxu0 %v2426_v26  ;;  %v2477_v26 = vld [vmem:[%s3047_s2 + $0x360] sm:$0xff]  }
  0x49   : > { %2226 = vmatpush3.bf16.msra.mxu1 %v2427_v27  ;;  %2233 = vmatprep.subr.bf16.mxu0 %v2428_v28  ;;  %v2478_v27 = vld [vmem:[%s3047_s2 + $0x3e0] sm:$0xff]  }
  0x4a   : > { %2255 = vmatprep.subr.bf16.mxu1 %v2429_v29  ;;  %v2479_v28 = vld [vmem:[%s3047_s2 + $0x320] sm:$0xff]  }
  0x4b   : > { %927 = vmatmul.mubr.bf16.vlgmr.msra.gmra.mrb[4].mxu0 %v2705_v42  ;;  %v2441_v42 = vld [vmem:[%s3047_s2 + $0x2d8] sm:$0xff]   ;;  %v2480_v29 = vld [vmem:[%s3047_s2 + $0x3a0] sm:$0xff]  }
  0x4c   : > { %967 = vmatmul.mubr.bf16.vlgmr.msra.gmra.mrb[4].mxu1 %v2708_v43  ;;  %2234 = vmatpush3.bf16.msra.mxu0 %v2430_v30  ;;  %v2442_v43 = vld [vmem:[%s3047_s2 + $0x218] sm:$0xff]   ;;  %v2481_v30 = vld [vmem:[%s3047_s2 + $0x368] sm:$0xff]  }
  0x4d   : > { %2256 = vmatpush3.bf16.msra.mxu1 %v2431_v31  ;;  %2235 = vmatprep.subr.bf16.mxu0 %v2432_v32  ;;  %v2482_v31 = vld [vmem:[%s3047_s2 + $0x3e8] sm:$0xff]  }
  0x4e   : > { %2257 = vmatprep.subr.bf16.mxu1 %v2433_v33  ;;  %1285 = vmatprep.mubr.bf16.mxu0 %v1055_v58  ;;  %v2483_v32 = vld [vmem:[%s3047_s2 + $0x328] sm:$0xff]  }
  0x4f   : > { %1325 = vmatprep.mubr.bf16.mxu1 %v1056_v62  ;;  %v2484_v33 = vld [vmem:[%s3047_s2 + $0x3a8] sm:$0xff]  }
  0x50   : > { %2236 = vmatpush3.bf16.msra.mxu0 %v2434_v34  ;;  %v2485_v34 = vld [vmem:[%s3047_s2 + $0x370] sm:$0xff]  }
  0x51   : > { %2258 = vmatpush3.bf16.msra.mxu1 %v2435_v35  ;;  %2237 = vmatprep.subr.bf16.mxu0 %v2436_v36  ;;  %v2486_v35 = vld [vmem:[%s3047_s2 + $0x3f0] sm:$0xff]   ;;  %v1402_v36 = vshll.u32 %v2889_v54, 16 }
  0x52   : > { %2259 = vmatprep.subr.bf16.mxu1 %v2437_v37  ;;  %v1416_v37 = vshll.u32 %v2900_v59, 16 }
  0x54   : > { %2238 = vmatpush3.bf16.msra.mxu0 %v2438_v38  ;;  %v2487_v38 = vld [vmem:[%s3047_s2 + $0x330] sm:$0xff]  }
  0x55   : > { %2260 = vmatpush3.bf16.msra.mxu1 %v2439_v39  ;;  %2239 = vmatprep.subr.bf16.mxu0 %v2440_v40  ;;  %v2488_v39 = vld [vmem:[%s3047_s2 + $0x3b0] sm:$0xff]   ;;  %v2489_v40 = vld [vmem:[%s3047_s2 + $0x378] sm:$0xff]  }
  0x56   : > { %2261 = vmatprep.subr.bf16.mxu1 %v2441_v42  ;;  %v2490_v42 = vld [vmem:[%s3047_s2 + $0x3f8] sm:$0xff]  }
  0x58   : > { %2240 = vmatpush3.bf16.msra.mxu0 %v2442_v43  ;;  %v1400_v43 = vshrl.u32 %v2889_v54, 16 }
  0x59   : > { %2262 = vmatpush3.bf16.msra.mxu1 %v2443_v44  ;;  %2241 = vmatprep.subr.bf16.mxu0 %v2444_v45  ;;  %v1404_v44 = vrot.slane %v1402_v36, 1  ;;  %v1414_v45 = vshrl.u32 %v2900_v59, 16 }
  0x5a   : > { %2263 = vmatprep.subr.bf16.mxu1 %v2445_v46  ;;  %v1418_v46 = vrot.slane %v1416_v37, 1 }
  0x5c   : > { %2242 = vmatpush3.bf16.msra.mxu0 %v2446_v47  ;;  %v2491_v47 = vld [vmem:[%s3047_s2 + $0x338] sm:$0xff]  }
  0x5d   : > { %2264 = vmatpush3.bf16.msra.mxu1 %v2447_v48  ;;  %2243 = vmatprep.subr.bf16.mxu0 %v2448_v49  ;;  %v2492_v48 = vld [vmem:[%s3047_s2 + $0x3b8] sm:$0xff]   ;;  %v1405_v49 = vor.u32 %v1404_v44, %v1400_v43 }
  0x5e   : > { %2265 = vmatprep.subr.bf16.mxu1 %v2449_v50  ;;  %v1419_v50 = vor.u32 %v1418_v46, %v1414_v45 }
  0x60   : > { %2244 = vmatpush3.bf16.msra.mxu0 %v2450_v51 }
  0x61   : > { %2266 = vmatpush3.bf16.msra.mxu1 %v2451_v53  ;;  %2245 = vmatprep.subr.bf16.mxu0 %v2452_v56 }
  0x62   : > { %2267 = vmatprep.subr.bf16.mxu1 %v2453_v57 }
  0x64   : > { %2246 = vmatpush3.bf16.msra.mxu0 %v2454_v60 }
  0x65   : > { %2268 = vmatpush3.bf16.msra.mxu1 %v2455_v61  ;;  %2247 = vmatprep.subr.bf16.mxu0 %v2456_v63 }
  0x66   : > { %2269 = vmatprep.subr.bf16.mxu1 %v2457_v41 }
  0x68   : > { %2248 = vmatpush3.bf16.msra.mxu0 %v2458_v0 }
  0x69   : > { %2270 = vmatpush3.bf16.msra.mxu1 %v2459_v1  ;;  %2277 = vmatprep.subr.bf16.mxu0 %v2461_v3 }
  0x6a   : > { %2299 = vmatprep.subr.bf16.mxu1 %v2462_v5 }
  0x6b   : > { %1286 = vmatmul.mubr.bf16.vlgmr.msra.gmra.mrb[8].mxu0 %v2889_v54 }
  0x6c   : > { %1326 = vmatmul.mubr.bf16.vlgmr.msra.gmra.mrb[8].mxu1 %v2900_v59  ;;  %2278 = vmatpush3.bf16.msra.mxu0 %v2463_v8 }
  0x6d   : > { %2300 = vmatpush3.bf16.msra.mxu1 %v2464_v11  ;;  %2279 = vmatprep.subr.bf16.mxu0 %v2465_v12 }
  0x6e   : > { %2301 = vmatprep.subr.bf16.mxu1 %v2466_v13  ;;  %1655 = vmatprep.mubr.bf16.mxu0 %v1412_v15 }
  0x6f   : > { %1695 = vmatprep.mubr.bf16.mxu1 %v1426_v16 }
  0x70   : > { %2280 = vmatpush3.bf16.msra.mxu0 %v2467_v14 }
  0x71   : > { %2302 = vmatpush3.bf16.msra.mxu1 %v2468_v17  ;;  %2281 = vmatprep.subr.bf16.mxu0 %v2469_v18 }
  0x72   : > { %2303 = vmatprep.subr.bf16.mxu1 %v2470_v19 }
  0x74   : > { %2282 = vmatpush3.bf16.msra.mxu0 %v2471_v20 }
  0x75   : > { %2304 = vmatpush3.bf16.msra.mxu1 %v2472_v21  ;;  %2283 = vmatprep.subr.bf16.mxu0 %v2473_v22 }
  0x76   : > { %2305 = vmatprep.subr.bf16.mxu1 %v2474_v23 }
  0x78   : > { %2284 = vmatpush3.bf16.msra.mxu0 %v2475_v24 }
  0x79   : > { %2306 = vmatpush3.bf16.msra.mxu1 %v2476_v25  ;;  %2285 = vmatprep.subr.bf16.mxu0 %v2477_v26 }
  0x7a   : > { %2307 = vmatprep.subr.bf16.mxu1 %v2478_v27 }
  0x7c   : > { %2286 = vmatpush3.bf16.msra.mxu0 %v2479_v28 }
  0x7d   : > { %2308 = vmatpush3.bf16.msra.mxu1 %v2480_v29  ;;  %2287 = vmatprep.subr.bf16.mxu0 %v2481_v30 }
  0x7e   : > { %2309 = vmatprep.subr.bf16.mxu1 %v2482_v31 }
  0x80   : > { %2288 = vmatpush3.bf16.msra.mxu0 %v2483_v32 }
  0x81   : > { %2310 = vmatpush3.bf16.msra.mxu1 %v2484_v33  ;;  %2289 = vmatprep.subr.bf16.mxu0 %v2485_v34 }
  0x82   : > { %2311 = vmatprep.subr.bf16.mxu1 %v2486_v35 }
  0x84   : > { %2290 = vmatpush3.bf16.msra.mxu0 %v2487_v38 }
  0x85   : > { %2312 = vmatpush3.bf16.msra.mxu1 %v2488_v39  ;;  %2291 = vmatprep.subr.bf16.mxu0 %v2489_v40 }
  0x86   : > { %2313 = vmatprep.subr.bf16.mxu1 %v2490_v42 }
  0x88   : > { %2292 = vmatpush3.bf16.msra.mxu0 %v2491_v47 }
  0x89   : > { %2314 = vmatpush3.bf16.msra.mxu1 %v2492_v48 }
  0x8b   : > { %1656 = vmatmul.mubr.bf16.vlgmr.msra.gmra.mrb[12].mxu0 %v1405_v49 }
  0x8c   : > { %1696 = vmatmul.mubr.bf16.vlgmr.msra.gmra.mrb[12].mxu1 %v1419_v50 }
  0xfe   : > { %v2161_v51 = vpop.f32.mrb[0].mxu0 }
  0xff   : > { %v2183_v52 = vpop.f32.mrb[0].mxu1  ;;  %v2162_v53 = vpop.f32.mrb[1].mxu0 }
 0x100   : > { %v2184_v54 = vpop.f32.mrb[1].mxu1  ;;  %v2163_v55 = vadd.f32 %v2162_v53, %v2161_v51  ;;  %v2164_v57 = vpop.f32.mrb[2].mxu0 }
 0x101   : > { %v2185_v56 = vadd.f32 %v2184_v54, %v2183_v52  ;;  %v2186_v58 = vpop.f32.mrb[2].mxu1  ;;  %v2165_v59 = vpop.f32.mrb[3].mxu0 }
 0x102   : > { %v2187_v60 = vpop.f32.mrb[3].mxu1 }
 0x103   : > { %v693_v61 = vadd.f32 %v2185_v56, %v2163_v55 }
 0x11e   : > { %v2205_v62 = vpop.f32.mrb[4].mxu0 }
 0x11f   : > { %v2227_v63 = vpop.f32.mrb[4].mxu1  ;;  %v2206_v41 = vpop.f32.mrb[5].mxu0 }
 0x120   : > { %v2228_v0 = vpop.f32.mrb[5].mxu1  ;;  %v2207_v1 = vadd.f32 %v2206_v41, %v2205_v62  ;;  %v2208_v3 = vpop.f32.mrb[6].mxu0 }
 0x121   : > { %v2229_v2 = vadd.f32 %v2228_v0, %v2227_v63  ;;  %v2230_v4 = vpop.f32.mrb[6].mxu1  ;;  %v2209_v5 = vpop.f32.mrb[7].mxu0 }
 0x122   : > { %v2231_v6 = vpop.f32.mrb[7].mxu1  ;;  %v929_v7 = vadd.f32 %v2207_v1, %v693_v61 }
 0x124   : > { %v969_v8 = vadd.f32 %v2229_v2, %v929_v7 }
 0x13e   : > { %v2249_v9 = vpop.f32.mrb[8].mxu0 }
 0x13f   : > { %v2271_v10 = vpop.f32.mrb[8].mxu1  ;;  %v2250_v11 = vpop.f32.mrb[9].mxu0 }
 0x140   : > { %v2272_v12 = vpop.f32.mrb[9].mxu1  ;;  %v2251_v13 = vadd.f32 %v2250_v11, %v2249_v9  ;;  %v2252_v15 = vpop.f32.mrb[10].mxu0 }
 0x141   : > { %v2273_v14 = vadd.f32 %v2272_v12, %v2271_v10  ;;  %v2274_v16 = vpop.f32.mrb[10].mxu1  ;;  %v2253_v17 = vpop.f32.mrb[11].mxu0 }
 0x142   : > { %v2275_v18 = vpop.f32.mrb[11].mxu1 }
 0x143   : > { %v1328_v19 = vadd.f32 %v2273_v14, %v2251_v13 }
 0x145   : > { %v1333_v20 = vadd.f32 %v1328_v19, %v969_v8 }
 0x15e   : > { %v2293_v21 = vpop.f32.mrb[12].mxu0 }
 0x15f   : > { %v2315_v22 = vpop.f32.mrb[12].mxu1  ;;  %v2294_v23 = vpop.f32.mrb[13].mxu0 }
 0x160   : > { %v2316_v24 = vpop.f32.mrb[13].mxu1  ;;  %v2295_v25 = vadd.f32 %v2294_v23, %v2293_v21  ;;  %v2296_v27 = vpop.f32.mrb[14].mxu0 }
 0x161   : > { %v2317_v26 = vadd.f32 %v2316_v24, %v2315_v22  ;;  %v2318_v28 = vpop.f32.mrb[14].mxu1  ;;  %v2297_v29 = vpop.f32.mrb[15].mxu0 }
 0x162   : > { %v2319_v30 = vpop.f32.mrb[15].mxu1 }
 0x163   : > { %v1698_v31 = vadd.f32 %v2317_v26, %v2295_v25 }
 0x165   : > { %v1703_v32 = vadd.f32 %v1698_v31, %v1333_v20 }
 0x167   : > { %vm1704_vm0 = vcmp.ge.f32.partialorder %v1703_v32, 0.0  ;;  %v1705_v33 = vmul.f32 0.2, %v1703_v32 }
 0x169   : > { %v1706_v34 = vsel %vm1704_vm0, %v1703_v32, %v1705_v33 }
 0x16a   : > { %v1707_v35 = vpack.c.bf16 %v1706_v34, %v1706_v34 }
 0x16c   : > { %1708 = vst [vmem:[%s243_s22] sm:$0x1] %v1707_v35 }
 0x16d PF: > { %s13_s16 = sadd.s32 1, %s2531_s16   ;;  %s3049_s12 = smov %s2523_s14 }
 0x16e   : > { %p10_p9 = scmp.ge.s32.totalorder %s13_s16, 6   ;;  %s3050_s13 = smov %s2527_s15 }
 0x16f   : > { %s3051_s14 = smov %s3054_s17  ;;  %s3052_s15 = smov %s3058_s18 }
 0x170   :  { %12 = sbr.rel (!%p10_p9) target bundleno = 3 (0x3), region = 68 }

// kernel: discriminator_linear_forward.7
= control target key start
LH: loop header
LB: loop body
LE: loop exit
PB: predicated region body
PF: predicated region fallthrough
CT: control target
= control target key end

     0   :  { %s2599_s18 = smov 0   ;;  %s3092_s0 = inlined_call_operand.vmem [shape: bf16[2,2,2,512], index: 0, kind: input, shape index: {}, may-alias: {0,1}]   ;;  %s3093_s1 = inlined_call_operand.vmem [shape: bf16[2,2,2,512], index: 1, kind: input, shape index: {}, may-alias: {0,1}]   ;;  %s3094_s2 = inlined_call_operand.vmem [shape: bf16[4,512,128], index: 2, kind: input, shape index: {}]   ;;  %s3095_s3 = inlined_call_operand.vmem [shape: f32[128,128], index: 3, kind: input, shape index: {}]   ;;  %s3096_s4 = inlined_call_operand.vmem [shape: f32[1,128], index: 4, kind: input, shape index: {}]   ;;  %s3097_s5 = inlined_call_operand.vmem [shape: f32[2,1,128], index: 5, kind: output, shape index: {}]  }
   0x1 LB: > { %s1833_s19 = sadd.s32 4294967295, %s2563_s18   ;;  %p1837_p0 = scmp.ge.s32.totalorder %s2563_s18, 1  ;;  %s2563_s18 = sphi %s2599_s18, %s15_s18  }
   0x2   : > { %p196_p1 = scmp.lt.s32.totalorder %s2563_s18, 3 }
   0x4   : > { %p197_p2 = pnand %p1837_p0, %p196_p1 }
   0x5   : > { %v2429_v0 = vld [vmem:[%s3094_s2 + $0x140] sm:$0xff] (!%p197_p2)   ;;  %v2433_v4 = vld [vmem:[%s3094_s2 + $0x148] sm:$0xff] (!%p197_p2)   ;;  %v2437_v8 = vld [vmem:[%s3094_s2 + $0x150] sm:$0xff] (!%p197_p2)   ;;  %p226_p3 = scmp.lt.s32.totalorder (!%p197_p2), %s1833_s19, 1  ;;  %v382_v30 = vlaneseq (!%p197_p2)  ;;  %v2565_v34 = vmov (!%p197_p2), 1966171168  }
   0x6   : > { %200 = sbr.rel (%p197_p2) target bundleno = 574 (0x23e), region = 40  ;;  %v2430_v1 = vld [vmem:[%s3094_s2 + $0x1c0] sm:$0xff] (!%p197_p2)   ;;  %2165 = vmatprep.subr.bf16.mxu0 (!%p197_p2), %v2429_v0  ;;  %v2434_v5 = vld [vmem:[%s3094_s2 + $0x1c8] sm:$0xff] (!%p197_p2)   ;;  %v2438_v9 = vld [vmem:[%s3094_s2 + $0x1d0] sm:$0xff] (!%p197_p2)   ;;  %v380_v35 = vunpack.c.l.s4 (!%p197_p2), %v2565_v34  ;;  %vm2567_vm0 = vmmov (!%p197_p2), 0  }
   0x7   : > { %v2431_v2 = vld [vmem:[%s3094_s2 + $0x100] sm:$0xff] (!%p197_p2)   ;;  %2187 = vmatprep.subr.bf16.mxu1 (!%p197_p2), %v2430_v1  ;;  %v2435_v6 = vld [vmem:[%s3094_s2 + $0x108] sm:$0xff] (!%p197_p2)   ;;  %v2439_v10 = vld [vmem:[%s3094_s2 + $0x110] sm:$0xff] (!%p197_p2)   ;;  %v383_v36 = vshrl.u32 (!%p197_p2), %v382_v30, 7 }
   0x8   : > { %v2432_v3 = vld [vmem:[%s3094_s2 + $0x180] sm:$0xff] (!%p197_p2)   ;;  %2166 = vmatpush3.bf16.msra.mxu0 (!%p197_p2), %v2431_v2  ;;  %v2436_v7 = vld [vmem:[%s3094_s2 + $0x188] sm:$0xff] (!%p197_p2)   ;;  %v2440_v11 = vld [vmem:[%s3094_s2 + $0x190] sm:$0xff] (!%p197_p2)   ;;  %v381_v40 = vunpack.c.0.s8 (!%p197_p2), %v380_v35 }
   0x9   : > { %2188 = vmatpush3.bf16.msra.mxu1 (!%p197_p2), %v2432_v3  ;;  %2167 = vmatprep.subr.bf16.mxu0 (!%p197_p2), %v2433_v4  ;;  %v2441_v12 = vld [vmem:[%s3094_s2 + $0x158] sm:$0xff] (!%p197_p2)   ;;  %v2445_v16 = vld [vmem:[%s3094_s2 + $0x160] sm:$0xff] (!%p197_p2)   ;;  %v2449_v20 = vld [vmem:[%s3094_s2 + $0x168] sm:$0xff] (!%p197_p2)  }
   0xa   : > { %2189 = vmatprep.subr.bf16.mxu1 (!%p197_p2), %v2434_v5  ;;  %v2442_v13 = vld [vmem:[%s3094_s2 + $0x1d8] sm:$0xff] (!%p197_p2)   ;;  %v2446_v17 = vld [vmem:[%s3094_s2 + $0x1e0] sm:$0xff] (!%p197_p2)   ;;  %v2450_v21 = vld [vmem:[%s3094_s2 + $0x1e8] sm:$0xff] (!%p197_p2)   ;;  %v2721_v41 = vsub.s32 (!%p197_p2), %v381_v40, %v383_v36 }
   0xb   : > { %v2443_v14 = vld [vmem:[%s3094_s2 + $0x118] sm:$0xff] (!%p197_p2)   ;;  %v2447_v18 = vld [vmem:[%s3094_s2 + $0x120] sm:$0xff] (!%p197_p2)   ;;  %v2451_v22 = vld [vmem:[%s3094_s2 + $0x128] sm:$0xff] (!%p197_p2)  }
   0xc   : > { %2168 = vmatpush3.bf16.msra.mxu0 (!%p197_p2), %v2435_v6  ;;  %v2444_v15 = vld [vmem:[%s3094_s2 + $0x198] sm:$0xff] (!%p197_p2)   ;;  %v2448_v19 = vld [vmem:[%s3094_s2 + $0x1a0] sm:$0xff] (!%p197_p2)   ;;  %v2452_v23 = vld [vmem:[%s3094_s2 + $0x1a8] sm:$0xff] (!%p197_p2)  }
   0xd   : > { %2190 = vmatpush3.bf16.msra.mxu1 %v2436_v7  ;;  %2169 = vmatprep.subr.bf16.mxu0 %v2437_v8  ;;  %s3099_s19 = smov (!%p226_p3, %s1833_s19), 1  ;;  %v2453_v24 = vld [vmem:[%s3094_s2 + $0x170] sm:$0xff]   ;;  %v2457_v28 = vld [vmem:[%s3094_s2 + $0x178] sm:$0xff]   ;;  %v2461_v37 = vld [vmem:[%s3094_s2 + $0x40] sm:$0xff]  }
   0xe   : > { %2191 = vmatprep.subr.bf16.mxu1 %v2438_v9  ;;  %v2454_v25 = vld [vmem:[%s3094_s2 + $0x1f0] sm:$0xff]   ;;  %s1838_s28 = sshll.u32 %s3099_s19, 3  ;;  %v2458_v29 = vld [vmem:[%s3094_s2 + $0x1f8] sm:$0xff]   ;;  %v2462_v38 = vld [vmem:[%s3094_s2 + $0xc0] sm:$0xff]   ;;  %s237_s25 = scalar_lea.vmem %s3097_s5, %s3099_s19 }
   0xf   : > { %v2455_v26 = vld [vmem:[%s3094_s2 + $0x130] sm:$0xff]   ;;  %s229_s12 = scalar_lea.vmem %s3092_s0, %s1838_s28  ;;  %v2459_v31 = vld [vmem:[%s3094_s2 + $0x138] sm:$0xff]   ;;  %v2463_v44 = vld [vmem:[%s3094_s2] sm:$0xff]   ;;  %s1802_s23 = scalar_lea.vmem %s3093_s1, %s1838_s28 }
  0x10   : > { %2170 = vmatpush3.bf16.msra.mxu0 %v2439_v10  ;;  %v2456_v27 = vld [vmem:[%s3094_s2 + $0x1b0] sm:$0xff]   ;;  %v2460_v32 = vld [vmem:[%s3094_s2 + $0x1b8] sm:$0xff]   ;;  %v1905_v33 = vld.sshfl [vmem:[%s229_s12] sm:$0x33 pattern:$0x75316420] }
  0x11   : > { %2192 = vmatpush3.bf16.msra.mxu1 %v2440_v11  ;;  %2171 = vmatprep.subr.bf16.mxu0 %v2441_v12  ;;  %v378_v39 = vcombine.high %v1905_v33, %v1905_v33  ;;  %v2725_v43 = vrot.slane %v1905_v33, %v2721_v41  ;;  %v2465_v49 = vld [vmem:[%s3094_s2 + $0x48] sm:$0xff]   ;;  %v2464_v52 = vld [vmem:[%s3094_s2 + $0x80] sm:$0xff]   ;;  %v2469_v55 = vld [vmem:[%s3094_s2 + $0x50] sm:$0xff]  }
  0x12   : > { %2193 = vmatprep.subr.bf16.mxu1 %v2442_v13  ;;  %v2466_v53 = vld [vmem:[%s3094_s2 + $0xc8] sm:$0xff]   ;;  %v2470_v57 = vld [vmem:[%s3094_s2 + $0xd0] sm:$0xff]   ;;  %v2473_v59 = vld [vmem:[%s3094_s2 + $0x58] sm:$0xff]  }
  0x13   : > { %v392_v42 = vrot.slane %v378_v39, %v2721_v41  ;;  %v396_v47 = vshrl.u32 %v2725_v43, 16  ;;  %v2733_v48 = vcombine.high %v2725_v43, %v2725_v43  ;;  %v2467_v54 = vld [vmem:[%s3094_s2 + $0x8] sm:$0xff]   ;;  %v2471_v58 = vld [vmem:[%s3094_s2 + $0x10] sm:$0xff]   ;;  %v2474_v61 = vld [vmem:[%s3094_s2 + $0xd8] sm:$0xff]  }
  0x14   : > { %2172 = vmatpush3.bf16.msra.mxu0 %v2443_v14  ;;  %v2468_v56 = vld [vmem:[%s3094_s2 + $0x88] sm:$0xff]   ;;  %v2472_v60 = vld [vmem:[%s3094_s2 + $0x90] sm:$0xff]   ;;  %v2475_v62 = vld [vmem:[%s3094_s2 + $0x18] sm:$0xff]  }
  0x15   : > { %2194 = vmatpush3.bf16.msra.mxu1 %v2444_v15  ;;  %2173 = vmatprep.subr.bf16.mxu0 %v2445_v16  ;;  %v399_v45 = vshrl.u32 %v392_v42, 16  ;;  %v394_v46 = vcombine.high %v392_v42, %v392_v42  ;;  %v402_v51 = vshrl.u32 %v2733_v48, 16  ;;  %v2477_v63 = vld [vmem:[%s3094_s2 + $0x60] sm:$0xff]   ;;  %v2476_v0 = vld [vmem:[%s3094_s2 + $0x98] sm:$0xff]   ;;  %v2481_v3 = vld [vmem:[%s3094_s2 + $0x68] sm:$0xff]  }
  0x16   : > { %2195 = vmatprep.subr.bf16.mxu1 %v2446_v17  ;;  %v2478_v1 = vld [vmem:[%s3094_s2 + $0xe0] sm:$0xff]   ;;  %v2482_v5 = vld [vmem:[%s3094_s2 + $0xe8] sm:$0xff]   ;;  %v2485_v7 = vld [vmem:[%s3094_s2 + $0x70] sm:$0xff]  }
  0x17   : > { %635 = vmatprep.mubr.bf16.mxu0 %v399_v45  ;;  %v405_v50 = vshrl.u32 %v394_v46, 16  ;;  %v2479_v2 = vld [vmem:[%s3094_s2 + $0x20] sm:$0xff]   ;;  %v2483_v6 = vld [vmem:[%s3094_s2 + $0x28] sm:$0xff]   ;;  %v2486_v9 = vld [vmem:[%s3094_s2 + $0xf0] sm:$0xff]  }
  0x18   : > { %2174 = vmatpush3.bf16.msra.mxu0 %v2447_v18  ;;  %v2480_v4 = vld [vmem:[%s3094_s2 + $0xa0] sm:$0xff]   ;;  %v2484_v8 = vld [vmem:[%s3094_s2 + $0xa8] sm:$0xff]   ;;  %v2487_v10 = vld [vmem:[%s3094_s2 + $0x30] sm:$0xff]  }
  0x19   : > { %2196 = vmatpush3.bf16.msra.mxu1 %v2448_v19  ;;  %2175 = vmatprep.subr.bf16.mxu0 %v2449_v20  ;;  %v2489_v11 = vld [vmem:[%s3094_s2 + $0x78] sm:$0xff]   ;;  %v2488_v12 = vld [vmem:[%s3094_s2 + $0xb0] sm:$0xff]   ;;  %v2493_v15 = vld [vmem:[%s3094_s2 + $0x240] sm:$0xff]  }
  0x1a   : > { %2197 = vmatprep.subr.bf16.mxu1 %v2450_v21  ;;  %675 = vmatprep.mubr.bf16.mxu1 %v405_v50  ;;  %v2490_v13 = vld [vmem:[%s3094_s2 + $0xf8] sm:$0xff]   ;;  %v2494_v17 = vld [vmem:[%s3094_s2 + $0x2c0] sm:$0xff]   ;;  %v2497_v19 = vld [vmem:[%s3094_s2 + $0x248] sm:$0xff]  }
  0x1b   : > { %v2491_v14 = vld [vmem:[%s3094_s2 + $0x38] sm:$0xff]   ;;  %v2495_v18 = vld [vmem:[%s3094_s2 + $0x200] sm:$0xff]   ;;  %v2498_v21 = vld [vmem:[%s3094_s2 + $0x2c8] sm:$0xff]  }
  0x1c   : > { %2176 = vmatpush3.bf16.msra.mxu0 %v2451_v22  ;;  %v2492_v16 = vld [vmem:[%s3094_s2 + $0xb8] sm:$0xff]   ;;  %v2496_v20 = vld [vmem:[%s3094_s2 + $0x280] sm:$0xff]   ;;  %v2499_v22 = vld [vmem:[%s3094_s2 + $0x208] sm:$0xff]  }
  0x1d   : > { %2198 = vmatpush3.bf16.msra.mxu1 %v2452_v23  ;;  %2177 = vmatprep.subr.bf16.mxu0 %v2453_v24  ;;  %v2501_v23 = vld [vmem:[%s3094_s2 + $0x250] sm:$0xff]   ;;  %v2500_v24 = vld [vmem:[%s3094_s2 + $0x288] sm:$0xff]   ;;  %v2507_v30 = vld [vmem:[%s3094_s2 + $0x218] sm:$0xff]  }
  0x1e   : > { %2199 = vmatprep.subr.bf16.mxu1 %v2454_v25  ;;  %v2502_v25 = vld [vmem:[%s3094_s2 + $0x2d0] sm:$0xff]   ;;  %v2510_v33 = vld [vmem:[%s3094_s2 + $0x2e0] sm:$0xff]   ;;  %v2513_v35 = vld [vmem:[%s3094_s2 + $0x268] sm:$0xff]  }
  0x1f   : > { %v2511_v34 = vld [vmem:[%s3094_s2 + $0x220] sm:$0xff]   ;;  %v2517_v39 = vld [vmem:[%s3094_s2 + $0x270] sm:$0xff]   ;;  %v2516_v40 = vld [vmem:[%s3094_s2 + $0x2a8] sm:$0xff]  }
  0x20   : > { %2178 = vmatpush3.bf16.msra.mxu0 %v2455_v26  ;;  %v2503_v26 = vld [vmem:[%s3094_s2 + $0x210] sm:$0xff]   ;;  %v2512_v36 = vld [vmem:[%s3094_s2 + $0x2a0] sm:$0xff]   ;;  %v2523_v50 = vld [vmem:[%s3094_s2 + $0x238] sm:$0xff]  }
  0x21   : > { %2200 = vmatpush3.bf16.msra.mxu1 %v2456_v27  ;;  %2179 = vmatprep.subr.bf16.mxu0 %v2457_v28  ;;  %v2505_v27 = vld [vmem:[%s3094_s2 + $0x258] sm:$0xff]   ;;  %v2504_v28 = vld [vmem:[%s3094_s2 + $0x290] sm:$0xff]   ;;  %v2034_v45 = vld.sshfl [vmem:[%s1802_s23 + $0x4] sm:$0x33 pattern:$0x75316420] }
  0x22   : > { %2201 = vmatprep.subr.bf16.mxu1 %v2458_v29  ;;  %v2506_v29 = vld [vmem:[%s3094_s2 + $0x2d8] sm:$0xff]  }
  0x24   : > { %2180 = vmatpush3.bf16.msra.mxu0 %v2459_v31  ;;  %v2509_v31 = vld [vmem:[%s3094_s2 + $0x260] sm:$0xff]  }
  0x25   : > { %2202 = vmatpush3.bf16.msra.mxu1 %v2460_v32  ;;  %2209 = vmatprep.subr.bf16.mxu0 %v2461_v37  ;;  %v2508_v32 = vld [vmem:[%s3094_s2 + $0x298] sm:$0xff]   ;;  %v2514_v37 = vld [vmem:[%s3094_s2 + $0x2e8] sm:$0xff]  }
  0x26   : > { %2231 = vmatprep.subr.bf16.mxu1 %v2462_v38  ;;  %v2515_v38 = vld [vmem:[%s3094_s2 + $0x228] sm:$0xff]  }
  0x27   : > { %636 = vmatmul.mubr.bf16.vlgmr.msra.gmra.mrb[0].mxu0 %v396_v47  ;;  %v2520_v47 = vld [vmem:[%s3094_s2 + $0x2b0] sm:$0xff]  }
  0x28   : > { %2210 = vmatpush3.bf16.msra.mxu0 %v2463_v44  ;;  %676 = vmatmul.mubr.bf16.vlgmr.msra.gmra.mrb[0].mxu1 %v402_v51  ;;  %v2521_v44 = vld [vmem:[%s3094_s2 + $0x278] sm:$0xff]  }
  0x29   : > { %2211 = vmatprep.subr.bf16.mxu0 %v2465_v49  ;;  %2232 = vmatpush3.bf16.msra.mxu1 %v2464_v52  ;;  %v2925_v52 = vrot.slane %v2034_v45, %v2721_v41 }
  0x2a   : > { %911 = vmatprep.mubr.bf16.mxu0 %v392_v42  ;;  %2233 = vmatprep.subr.bf16.mxu1 %v2466_v53  ;;  %v2518_v42 = vld [vmem:[%s3094_s2 + $0x2f0] sm:$0xff]   ;;  %v2525_v53 = vld [vmem:[%s3094_s2 + $0x340] sm:$0xff]  }
  0x2b   : > { %951 = vmatprep.mubr.bf16.mxu1 %v394_v46  ;;  %v1032_v46 = vcombine.high %v2034_v45, %v2034_v45 }
  0x2c   : > { %2212 = vmatpush3.bf16.msra.mxu0 %v2467_v54  ;;  %v2524_v54 = vld [vmem:[%s3094_s2 + $0x2b8] sm:$0xff]  }
  0x2d   : > { %2213 = vmatprep.subr.bf16.mxu0 %v2469_v55  ;;  %2234 = vmatpush3.bf16.msra.mxu1 %v2468_v56  ;;  %v1046_v49 = vrot.slane %v1032_v46, %v2721_v41  ;;  %v2526_v55 = vld [vmem:[%s3094_s2 + $0x3c0] sm:$0xff]  }
  0x2e   : > { %2235 = vmatprep.subr.bf16.mxu1 %v2470_v57  ;;  %v2527_v41 = vld [vmem:[%s3094_s2 + $0x300] sm:$0xff]   ;;  %v2941_v57 = vcombine.high %v2925_v52, %v2925_v52 }
  0x2f   : > { %v1048_v51 = vcombine.high %v1046_v49, %v1046_v49  ;;  %v1395_v56 = vshrl.u32 %v1046_v49, 16  ;;  %v1695_v46 = vld [vmem:[%s3095_s3 + $0x60] sm:$0xff] }
  0x30   : > { %2214 = vmatpush3.bf16.msra.mxu0 %v2471_v58  ;;  %v2529_v58 = vld [vmem:[%s3094_s2 + $0x348] sm:$0xff]  }
  0x31   : > { %2215 = vmatprep.subr.bf16.mxu0 %v2473_v59  ;;  %2236 = vmatpush3.bf16.msra.mxu1 %v2472_v60  ;;  %v2528_v59 = vld [vmem:[%s3094_s2 + $0x380] sm:$0xff]   ;;  %v1401_v60 = vshrl.u32 %v1048_v51, 16 }
  0x32   : > { %2237 = vmatprep.subr.bf16.mxu1 %v2474_v61  ;;  %v2530_v61 = vld [vmem:[%s3094_s2 + $0x3c8] sm:$0xff]  }
  0x34   : > { %2216 = vmatpush3.bf16.msra.mxu0 %v2475_v62  ;;  %v2531_v62 = vld [vmem:[%s3094_s2 + $0x308] sm:$0xff]  }
  0x35   : > { %2217 = vmatprep.subr.bf16.mxu0 %v2477_v63  ;;  %2238 = vmatpush3.bf16.msra.mxu1 %v2476_v0  ;;  %v2533_v63 = vld [vmem:[%s3094_s2 + $0x350] sm:$0xff]   ;;  %v2532_v0 = vld [vmem:[%s3094_s2 + $0x388] sm:$0xff]  }
  0x36   : > { %2239 = vmatprep.subr.bf16.mxu1 %v2478_v1  ;;  %v2534_v1 = vld [vmem:[%s3094_s2 + $0x3d0] sm:$0xff]  }
  0x38   : > { %2218 = vmatpush3.bf16.msra.mxu0 %v2479_v2  ;;  %v2535_v2 = vld [vmem:[%s3094_s2 + $0x310] sm:$0xff]  }
  0x39   : > { %2219 = vmatprep.subr.bf16.mxu0 %v2481_v3  ;;  %2240 = vmatpush3.bf16.msra.mxu1 %v2480_v4  ;;  %v2537_v3 = vld [vmem:[%s3094_s2 + $0x358] sm:$0xff]   ;;  %v2536_v4 = vld [vmem:[%s3094_s2 + $0x390] sm:$0xff]  }
  0x3a   : > { %2241 = vmatprep.subr.bf16.mxu1 %v2482_v5  ;;  %v2538_v5 = vld [vmem:[%s3094_s2 + $0x3d8] sm:$0xff]  }
  0x3c   : > { %2220 = vmatpush3.bf16.msra.mxu0 %v2483_v6  ;;  %v2539_v6 = vld [vmem:[%s3094_s2 + $0x318] sm:$0xff]  }
  0x3d   : > { %2221 = vmatprep.subr.bf16.mxu0 %v2485_v7  ;;  %2242 = vmatpush3.bf16.msra.mxu1 %v2484_v8  ;;  %v2541_v7 = vld [vmem:[%s3094_s2 + $0x360] sm:$0xff]   ;;  %v2540_v8 = vld [vmem:[%s3094_s2 + $0x398] sm:$0xff]  }
  0x3e   : > { %2243 = vmatprep.subr.bf16.mxu1 %v2486_v9  ;;  %v2542_v9 = vld [vmem:[%s3094_s2 + $0x3e0] sm:$0xff]  }
  0x40   : > { %2222 = vmatpush3.bf16.msra.mxu0 %v2487_v10  ;;  %v2543_v10 = vld [vmem:[%s3094_s2 + $0x320] sm:$0xff]  }
  0x41   : > { %2223 = vmatprep.subr.bf16.mxu0 %v2489_v11  ;;  %2244 = vmatpush3.bf16.msra.mxu1 %v2488_v12  ;;  %v2545_v11 = vld [vmem:[%s3094_s2 + $0x368] sm:$0xff]   ;;  %v2544_v12 = vld [vmem:[%s3094_s2 + $0x3a0] sm:$0xff]  }
  0x42   : > { %2245 = vmatprep.subr.bf16.mxu1 %v2490_v13  ;;  %v2546_v13 = vld [vmem:[%s3094_s2 + $0x3e8] sm:$0xff]  }
  0x44   : > { %2224 = vmatpush3.bf16.msra.mxu0 %v2491_v14  ;;  %v2547_v14 = vld [vmem:[%s3094_s2 + $0x328] sm:$0xff]  }
  0x45   : > { %2253 = vmatprep.subr.bf16.mxu0 %v2493_v15  ;;  %2246 = vmatpush3.bf16.msra.mxu1 %v2492_v16  ;;  %v2549_v15 = vld [vmem:[%s3094_s2 + $0x370] sm:$0xff]   ;;  %v2548_v16 = vld [vmem:[%s3094_s2 + $0x3a8] sm:$0xff]  }
  0x46   : > { %2275 = vmatprep.subr.bf16.mxu1 %v2494_v17  ;;  %v2550_v17 = vld [vmem:[%s3094_s2 + $0x3f0] sm:$0xff]  }
  0x47   : > { %912 = vmatmul.mubr.bf16.vlgmr.msra.gmra.mrb[4].mxu0 %v2725_v43  ;;  %v2519_v43 = vld [vmem:[%s3094_s2 + $0x230] sm:$0xff]  }
  0x48   : > { %2254 = vmatpush3.bf16.msra.mxu0 %v2495_v18  ;;  %952 = vmatmul.mubr.bf16.vlgmr.msra.gmra.mrb[4].mxu1 %v2733_v48  ;;  %v2522_v48 = vld [vmem:[%s3094_s2 + $0x2f8] sm:$0xff]   ;;  %v2551_v18 = vld [vmem:[%s3094_s2 + $0x330] sm:$0xff]  }
  0x49   : > { %2255 = vmatprep.subr.bf16.mxu0 %v2497_v19  ;;  %2276 = vmatpush3.bf16.msra.mxu1 %v2496_v20  ;;  %v2553_v19 = vld [vmem:[%s3094_s2 + $0x378] sm:$0xff]   ;;  %v2552_v20 = vld [vmem:[%s3094_s2 + $0x3b0] sm:$0xff]  }
  0x4a   : > { %2277 = vmatprep.subr.bf16.mxu1 %v2498_v21  ;;  %1277 = vmatprep.mubr.bf16.mxu0 %v1046_v49  ;;  %v2554_v21 = vld [vmem:[%s3094_s2 + $0x3f8] sm:$0xff]   ;;  %v1697_v49 = vld [vmem:[%s3095_s3 + $0x70] sm:$0xff] }
  0x4b   : > { %1317 = vmatprep.mubr.bf16.mxu1 %v1048_v51 }
  0x4c   : > { %2256 = vmatpush3.bf16.msra.mxu0 %v2499_v22  ;;  %v2555_v22 = vld [vmem:[%s3094_s2 + $0x338] sm:$0xff]  }
  0x4d   : > { %2257 = vmatprep.subr.bf16.mxu0 %v2501_v23  ;;  %2278 = vmatpush3.bf16.msra.mxu1 %v2500_v24  ;;  %v2556_v23 = vld [vmem:[%s3094_s2 + $0x3b8] sm:$0xff]   ;;  %v1392_v24 = vshrl.u32 %v2925_v52, 16 }
  0x4e   : > { %2279 = vmatprep.subr.bf16.mxu1 %v2502_v25  ;;  %v1398_v25 = vshrl.u32 %v2941_v57, 16 }
  0x50   : > { %2258 = vmatpush3.bf16.msra.mxu0 %v2503_v26  ;;  %v1683_v26 = vld [vmem:[%s3095_s3] sm:$0xff] }
  0x51   : > { %2259 = vmatprep.subr.bf16.mxu0 %v2505_v27  ;;  %2280 = vmatpush3.bf16.msra.mxu1 %v2504_v28  ;;  %v1684_v27 = vld [vmem:[%s3095_s3 + $0x8] sm:$0xff]  ;;  %v1685_v28 = vld [vmem:[%s3095_s3 + $0x10] sm:$0xff] }
  0x52   : > { %2281 = vmatprep.subr.bf16.mxu1 %v2506_v29  ;;  %v2566_v29 = vmov 0.0|0.0  }
  0x54   : > { %2260 = vmatpush3.bf16.msra.mxu0 %v2507_v30  ;;  %v2394_v30 = vpack.c.bf16 %v1684_v27, %v1683_v26 }
  0x55   : > { %2261 = vmatprep.subr.bf16.mxu0 %v2509_v31  ;;  %2282 = vmatpush3.bf16.msra.mxu1 %v2508_v32  ;;  %v1686_v31 = vld [vmem:[%s3095_s3 + $0x18] sm:$0xff] }
  0x56   : > { %2283 = vmatprep.subr.bf16.mxu1 %v2510_v33  ;;  %v2397_v32 = vpack.c.bf16 %v1686_v31, %v1685_v28  ;;  %v1687_v33 = vld [vmem:[%s3095_s3 + $0x20] sm:$0xff] }
  0x58   : > { %2262 = vmatpush3.bf16.msra.mxu0 %v2511_v34  ;;  %v1688_v34 = vld [vmem:[%s3095_s3 + $0x28] sm:$0xff] }
  0x59   : > { %2263 = vmatprep.subr.bf16.mxu0 %v2513_v35  ;;  %2284 = vmatpush3.bf16.msra.mxu1 %v2512_v36  ;;  %v2400_v35 = vpack.c.bf16 %v1688_v34, %v1687_v33  ;;  %v1689_v36 = vld [vmem:[%s3095_s3 + $0x30] sm:$0xff] }
  0x5a   : > { %2285 = vmatprep.subr.bf16.mxu1 %v2514_v37  ;;  %v1690_v37 = vld [vmem:[%s3095_s3 + $0x38] sm:$0xff] }
  0x5c   : > { %2264 = vmatpush3.bf16.msra.mxu0 %v2515_v38  ;;  %v2403_v38 = vpack.c.bf16 %v1690_v37, %v1689_v36  ;;  %v1699_v37 = vld [vmem:[%s3096_s4] sm:$0x1] }
  0x5d   : > { %2265 = vmatprep.subr.bf16.mxu0 %v2517_v39  ;;  %2286 = vmatpush3.bf16.msra.mxu1 %v2516_v40  ;;  %v1691_v39 = vld [vmem:[%s3095_s3 + $0x40] sm:$0xff]  ;;  %v1692_v40 = vld [vmem:[%s3095_s3 + $0x48] sm:$0xff] }
  0x5e   : > { %2287 = vmatprep.subr.bf16.mxu1 %v2518_v42  ;;  %v2406_v42 = vpack.c.bf16 %v1692_v40, %v1691_v39 }
  0x60   : > { %2266 = vmatpush3.bf16.msra.mxu0 %v2519_v43  ;;  %v1693_v43 = vld [vmem:[%s3095_s3 + $0x50] sm:$0xff] }
  0x61   : > { %2267 = vmatprep.subr.bf16.mxu0 %v2521_v44  ;;  %2288 = vmatpush3.bf16.msra.mxu1 %v2520_v47  ;;  %v1694_v44 = vld [vmem:[%s3095_s3 + $0x58] sm:$0xff]  ;;  %v1696_v47 = vld [vmem:[%s3095_s3 + $0x68] sm:$0xff] }
  0x62   : > { %2289 = vmatprep.subr.bf16.mxu1 %v2522_v48  ;;  %v2409_v45 = vpack.c.bf16 %v1694_v44, %v1693_v43  ;;  %v2412_v48 = vpack.c.bf16 %v1696_v47, %v1695_v46 }
  0x64   : > { %2268 = vmatpush3.bf16.msra.mxu0 %v2523_v50  ;;  %v1698_v50 = vld [vmem:[%s3095_s3 + $0x78] sm:$0xff] }
  0x65   : > { %2297 = vmatprep.subr.bf16.mxu0 %v2525_v53  ;;  %2290 = vmatpush3.bf16.msra.mxu1 %v2524_v54  ;;  %v2415_v51 = vpack.c.bf16 %v1698_v50, %v1697_v49 }
  0x66   : > { %2319 = vmatprep.subr.bf16.mxu1 %v2526_v55 }
  0x67   : > { %1278 = vmatmul.mubr.bf16.vlgmr.msra.gmra.mrb[8].mxu0 %v2925_v52  ;;  %v2568_v52 = vmov 0.0  }
  0x68   : > { %2298 = vmatpush3.bf16.msra.mxu0 %v2527_v41  ;;  %1631 = vmatprep.mubr.bf16.mxu0 %v1395_v56 }
  0x69   : > { %1318 = vmatmul.mubr.bf16.vlgmr.msra.gmra.mrb[8].mxu1 %v2941_v57  ;;  %2299 = vmatprep.subr.bf16.mxu0 %v2529_v58 }
  0x6a   : > { %2320 = vmatpush3.bf16.msra.mxu1 %v2528_v59  ;;  %1671 = vmatprep.mubr.bf16.mxu1 %v1401_v60 }
  0x6b   : > { %2321 = vmatprep.subr.bf16.mxu1 %v2530_v61 }
  0x6c   : > { %2300 = vmatpush3.bf16.msra.mxu0 %v2531_v62 }
  0x6d   : > { %2301 = vmatprep.subr.bf16.mxu0 %v2533_v63 }
  0x6e   : > { %2322 = vmatpush3.bf16.msra.mxu1 %v2532_v0 }
  0x6f   : > { %2323 = vmatprep.subr.bf16.mxu1 %v2534_v1 }
  0x70   : > { %2302 = vmatpush3.bf16.msra.mxu0 %v2535_v2 }
  0x71   : > { %2303 = vmatprep.subr.bf16.mxu0 %v2537_v3 }
  0x72   : > { %2324 = vmatpush3.bf16.msra.mxu1 %v2536_v4 }
  0x73   : > { %2325 = vmatprep.subr.bf16.mxu1 %v2538_v5 }
  0x74   : > { %2304 = vmatpush3.bf16.msra.mxu0 %v2539_v6 }
  0x75   : > { %2305 = vmatprep.subr.bf16.mxu0 %v2541_v7 }
  0x76   : > { %2326 = vmatpush3.bf16.msra.mxu1 %v2540_v8 }
  0x77   : > { %2327 = vmatprep.subr.bf16.mxu1 %v2542_v9 }
  0x78   : > { %2306 = vmatpush3.bf16.msra.mxu0 %v2543_v10 }
  0x79   : > { %2307 = vmatprep.subr.bf16.mxu0 %v2545_v11 }
  0x7a   : > { %2328 = vmatpush3.bf16.msra.mxu1 %v2544_v12 }
  0x7b   : > { %2329 = vmatprep.subr.bf16.mxu1 %v2546_v13 }
  0x7c   : > { %2308 = vmatpush3.bf16.msra.mxu0 %v2547_v14 }
  0x7d   : > { %2309 = vmatprep.subr.bf16.mxu0 %v2549_v15 }
  0x7e   : > { %2330 = vmatpush3.bf16.msra.mxu1 %v2548_v16 }
  0x7f   : > { %2331 = vmatprep.subr.bf16.mxu1 %v2550_v17 }
  0x80   : > { %2310 = vmatpush3.bf16.msra.mxu0 %v2551_v18 }
  0x81   : > { %2311 = vmatprep.subr.bf16.mxu0 %v2553_v19 }
  0x82   : > { %2332 = vmatpush3.bf16.msra.mxu1 %v2552_v20 }
  0x83   : > { %2333 = vmatprep.subr.bf16.mxu1 %v2554_v21 }
  0x84   : > { %2312 = vmatpush3.bf16.msra.mxu0 %v2555_v22 }
  0x85   : > { %2393 = vmatprep.subr.bf16.mxu0 %v2566_v29 }
  0x86   : > { %2334 = vmatpush3.bf16.msra.mxu1 %v2556_v23 }
  0x87   : > { %1632 = vmatmul.mubr.bf16.vlgmr.msra.gmra.mrb[12].mxu0 %v1392_v24 }
  0x88   : > { %2395 = vmatpush3.bf16.msra.mxu0 %v2394_v30  ;;  %2390 = vmatprep.mubr.msk.f32.mxu0 %vm2567_vm0, %v2568_v52 }
  0x89   : > { %1672 = vmatmul.mubr.bf16.vlgmr.msra.gmra.mrb[12].mxu1 %v1398_v25  ;;  %2396 = vmatprep.subr.bf16.mxu0 %v2566_v29 }
  0x8c   : > { %2398 = vmatpush3.bf16.msra.mxu0 %v2397_v32 }
  0x8d   : > { %2399 = vmatprep.subr.bf16.mxu0 %v2566_v29 }
  0x90   : > { %2401 = vmatpush3.bf16.msra.mxu0 %v2400_v35 }
  0x91   : > { %2402 = vmatprep.subr.bf16.mxu0 %v2566_v29 }
  0x94   : > { %2404 = vmatpush3.bf16.msra.mxu0 %v2403_v38 }
  0x95   : > { %2405 = vmatprep.subr.bf16.mxu0 %v2566_v29 }
  0x98   : > { %2407 = vmatpush3.bf16.msra.mxu0 %v2406_v42 }
  0x99   : > { %2408 = vmatprep.subr.bf16.mxu0 %v2566_v29 }
  0x9c   : > { %2410 = vmatpush3.bf16.msra.mxu0 %v2409_v45 }
  0x9d   : > { %2411 = vmatprep.subr.bf16.mxu0 %v2566_v29 }
  0xa0   : > { %2413 = vmatpush3.bf16.msra.mxu0 %v2412_v48 }
  0xa1   : > { %2414 = vmatprep.subr.bf16.mxu0 %v2566_v29 }
  0xa4   : > { %2416 = vmatpush3.bf16.msra.mxu0 %v2415_v51 }
  0xfa   : > { %v2181_v53 = vpop.f32.mrb[0].mxu0 }
  0xfb   : > { %v2182_v54 = vpop.f32.mrb[1].mxu0  ;;  %v2203_v55 = vpop.f32.mrb[0].mxu1 }
  0xfc   : > { %v2183_v41 = vadd.f32 %v2182_v54, %v2181_v53  ;;  %v2184_v56 = vpop.f32.mrb[2].mxu0  ;;  %v2204_v57 = vpop.f32.mrb[1].mxu1 }
  0xfd   : > { %v2185_v58 = vpop.f32.mrb[3].mxu0  ;;  %v2205_v59 = vadd.f32 %v2204_v57, %v2203_v55  ;;  %v2206_v60 = vpop.f32.mrb[2].mxu1 }
  0xfe   : > { %v2207_v61 = vpop.f32.mrb[3].mxu1 }
  0xff   : > { %v678_v62 = vadd.f32 %v2205_v59, %v2183_v41 }
 0x11a   : > { %v2225_v63 = vpop.f32.mrb[4].mxu0 }
 0x11b   : > { %v2226_v0 = vpop.f32.mrb[5].mxu0  ;;  %v2247_v1 = vpop.f32.mrb[4].mxu1 }
 0x11c   : > { %v2227_v2 = vadd.f32 %v2226_v0, %v2225_v63  ;;  %v2228_v3 = vpop.f32.mrb[6].mxu0  ;;  %v2248_v4 = vpop.f32.mrb[5].mxu1 }
 0x11d   : > { %v2229_v5 = vpop.f32.mrb[7].mxu0  ;;  %v2249_v7 = vadd.f32 %v2248_v4, %v2247_v1  ;;  %v2250_v8 = vpop.f32.mrb[6].mxu1 }
 0x11e   : > { %v914_v6 = vadd.f32 %v2227_v2, %v678_v62  ;;  %v2251_v9 = vpop.f32.mrb[7].mxu1 }
 0x120   : > { %v954_v10 = vadd.f32 %v2249_v7, %v914_v6 }
 0x13a   : > { %v2269_v11 = vpop.f32.mrb[8].mxu0 }
 0x13b   : > { %v2270_v12 = vpop.f32.mrb[9].mxu0 }
 0x13c   : > { %v2291_v13 = vpop.f32.mrb[8].mxu1  ;;  %v2271_v14 = vadd.f32 %v2270_v12, %v2269_v11  ;;  %v2272_v15 = vpop.f32.mrb[10].mxu0 }
 0x13d   : > { %v2292_v16 = vpop.f32.mrb[9].mxu1  ;;  %v2273_v17 = vpop.f32.mrb[11].mxu0 }
 0x13e   : > { %v2293_v18 = vadd.f32 %v2292_v16, %v2291_v13  ;;  %v2294_v19 = vpop.f32.mrb[10].mxu1 }
 0x13f   : > { %v2295_v20 = vpop.f32.mrb[11].mxu1 }
 0x140   : > { %v1320_v21 = vadd.f32 %v2293_v18, %v2271_v14 }
 0x142   : > { %v1325_v22 = vadd.f32 %v1320_v21, %v954_v10 }
 0x15a   : > { %v2313_v23 = vpop.f32.mrb[12].mxu0 }
 0x15b   : > { %v2314_v24 = vpop.f32.mrb[13].mxu0 }
 0x15c   : > { %v2335_v25 = vpop.f32.mrb[12].mxu1  ;;  %v2315_v26 = vadd.f32 %v2314_v24, %v2313_v23  ;;  %v2316_v27 = vpop.f32.mrb[14].mxu0 }
 0x15d   : > { %v2336_v28 = vpop.f32.mrb[13].mxu1  ;;  %v2317_v29 = vpop.f32.mrb[15].mxu0 }
 0x15e   : > { %v2337_v30 = vadd.f32 %v2336_v28, %v2335_v25  ;;  %v2338_v31 = vpop.f32.mrb[14].mxu1 }
 0x15f   : > { %v2339_v32 = vpop.f32.mrb[15].mxu1 }
 0x160   : > { %v1674_v33 = vadd.f32 %v2337_v30, %v2315_v26 }
 0x162   : > { %v1679_v34 = vadd.f32 %v1674_v33, %v1325_v22 }
 0x164   : > { %vm1680_vm1 = vcmp.ge.f32.partialorder %v1679_v34, 0.0  ;;  %v1681_v35 = vmul.f32 0.2, %v1679_v34 }
 0x166   : > { %v1682_v36 = vsel %vm1680_vm1, %v1679_v34, %v1681_v35 }
 0x167   : > { %2391 = vmatmul.mubr.f32.vlgmr.msra.gmra.mrb[16].mxu0 %v1682_v36 }
 0x23a   : > { %v1766_v38 = vpop.f32.mrb[16].mxu0 }
 0x23b   : > { %v1767_v39 = vadd.f32 %v1766_v38, %v1699_v37  ;;  %v2392_v40 = vpop.f32.mrb[17].mxu0 }
 0x23d   : > { %1770 = vst [vmem:[%s237_s25] sm:$0x1] %v1767_v39 }
 0x23e PF: > { %s15_s18 = sadd.s32 1, %s2563_s18  }
 0x23f   : > { %p12_p4 = scmp.ge.s32.totalorder %s15_s18, 4  }
 0x241   :  { %14 = sbr.rel (!%p12_p4) target bundleno = 1 (0x1), region = 76 }

</bundles_post_ra>
